<compile_context>
chip_gen: v7x
topology: tpu7x:2x2x1
jax: 0.10.0
libtpu: 0.0.40
codegen_flags: <defaults>
</compile_context>

<pallas_src>
import jax
import jax.numpy as jnp
from jax import lax
from jax.experimental import pallas as pl
from jax.experimental.pallas import tpu as pltpu


def gru_packed_kernel(x_ref, len_ref, wih_ref, whh_ref, bih_ref, bhh_ref,
                      out_ref, hid_ref, xw_ref):
    """Packed-sequence GRU.

    x_ref:   (T, B, E)   time-major embedded inputs (B padded to multiple of 8)
    len_ref: (B, 1)      int32 sequence lengths (0 for padded batch rows)
    wih_ref: (E, 3H)     gate-concatenated input->hidden weights, order [r|z|n]
    whh_ref: (H, 3H)     gate-concatenated hidden->hidden weights
    bih_ref: (1, 3H)     input-side bias
    bhh_ref: (1, 3H)     hidden-side bias
    out_ref: (T, B, H)   per-step hidden states (zero past each row's length)
    hid_ref: (B, H)      final hidden state per row (at t = length - 1)
    xw_ref:  (T, B, 3H)  VMEM scratch holding the precomputed input projection
    """
    T, B, H = out_ref.shape
    E = x_ref.shape[-1]

    # ---- Pass 1 (fully parallel, off the serial critical path):
    # input projection for ALL timesteps as one well-shaped matmul, M = T*B.
    x2 = x_ref[...].reshape(T * B, E)
    xw = jnp.dot(x2, wih_ref[...], preferred_element_type=jnp.float32) + bih_ref[...]
    xw_ref[...] = xw.reshape(T, B, 3 * H)

    # ---- Loop invariants hoisted out of the recurrence (vreg-resident).
    whh = whh_ref[...]                                   # (H, 3H)
    bhh = jnp.broadcast_to(bhh_ref[...], (B, 3 * H))     # hoisted broadcast
    lengths = len_ref[...]                               # (B, 1) int32

    # ---- Pass 2: serial recurrence. One gate-stacked MXU dot per step,
    # hidden state carried as a value, loop fully unrolled (T small, static).
    def step(t, carry):
        h_prev, hid = carry                              # (B, H), (B, H)
        gx = xw_ref[t]                                   # (B, 3H) precomputed
        gh = jnp.dot(h_prev, whh, preferred_element_type=jnp.float32) + bhh
        r = jax.nn.sigmoid(gx[:, 0:H] + gh[:, 0:H])
        z = jax.nn.sigmoid(gx[:, H:2 * H] + gh[:, H:2 * H])
        n = jnp.tanh(gx[:, 2 * H:3 * H] + r * gh[:, 2 * H:3 * H])
        h_new = (1.0 - z) * n + z * h_prev               # (B, H)

        valid = lengths > t                              # (B, 1) packed-seq mask
        out_ref[t] = jnp.where(valid, h_new, 0.0).astype(out_ref.dtype)
        h_next = jnp.where(valid, h_new, h_prev)         # frozen rows don't advance
        hid = jnp.where(lengths == t + 1, h_new, hid)    # capture last valid step
        return (h_next, hid)

    h0 = jnp.zeros((B, H), jnp.float32)
    _, hid = lax.fori_loop(0, T, step, (h0, h0), unroll=True)
    hid_ref[...] = hid.astype(hid_ref.dtype)


def question_embedding_forward(questions, question_length, params):
    """JAX wrapper reproducing QuestionEmbedding.forward.

    questions:       (B, T) int token ids
    question_length: (B,)   int valid lengths (assumed max(length) == T, i.e.
                             pad_packed_sequence's padded width equals T)
    returns (hidden, outputs) with hidden:(B, 1, H), outputs:(B, T, H)
    """
    # Embedding lookup + dropout (eval -> identity): plain-JAX glue.
    emb = jnp.take(params["embed"], questions.astype(jnp.int32), axis=0)   # (B,T,E)
    B, T, E = emb.shape
    H = params["w_hh"].shape[-1]

    # Pad batch to the 8-sublane granule; padded rows get length 0 so they
    # never advance and only ever produce zeros.
    B_pad = max(8, ((B + 7) // 8) * 8)

    x_tm = jnp.transpose(emb, (1, 0, 2)).astype(jnp.float32)               # (T,B,E)
    lens = question_length.astype(jnp.int32).reshape(B, 1)
    if B_pad != B:
        x_tm = jnp.pad(x_tm, ((0, 0), (0, B_pad - B), (0, 0)))
        lens = jnp.pad(lens, ((0, B_pad - B), (0, 0)))

    # Gate-concatenated weights/biases, PyTorch gate order [r | z | n] on lanes.
    w_ih_cat = jnp.concatenate([params["w_ih"][g] for g in range(3)], axis=-1)  # (E,3H)
    w_hh_cat = jnp.concatenate([params["w_hh"][g] for g in range(3)], axis=-1)  # (H,3H)
    b_ih_cat = jnp.concatenate([params["b_ih"][g] for g in range(3)], axis=-1)  # (1,3H)
    b_hh_cat = jnp.concatenate([params["b_hh"][g] for g in range(3)], axis=-1)  # (1,3H)

    # TODO(synk): at production sizes (large B/T/H) add a batch-parallel grid
    # axis (v7x dual TC), tile over B instead of whole-array VMEM specs, and
    # cast matmul operands to bf16 on v6e/v7x (keep f32 accumulation).
    vmem = pl.BlockSpec(memory_space=pltpu.MemorySpace.VMEM)
    outputs_tm, hidden = pl.pallas_call(
        gru_packed_kernel,
        out_shape=(jax.ShapeDtypeStruct((T, B_pad, H), jnp.float32),
                   jax.ShapeDtypeStruct((B_pad, H), jnp.float32)),
        in_specs=[vmem] * 6,
        out_specs=(vmem, vmem),
        scratch_shapes=[pltpu.VMEM((T, B_pad, 3 * H), jnp.float32)],
    )(x_tm, lens, w_ih_cat, w_hh_cat, b_ih_cat, b_hh_cat)

    outputs = jnp.transpose(outputs_tm[:, :B, :], (1, 0, 2))   # (B, T, H)
    hidden = hidden[:B, None, :]                               # (B, 1, H)
    return hidden, outputs


def init_params(key, vocab_nums, vocab_size, hidden_size):
    """Deterministic synthetic parameters (PyTorch-style shapes/init scale)."""
    k1, k2, k3, k4, k5 = jax.random.split(key, 5)
    s = 1.0 / float(hidden_size) ** 0.5
    return dict(
        embed=jax.random.normal(k1, (vocab_nums, vocab_size), jnp.float32),
        w_ih=jax.random.uniform(k2, (3, vocab_size, hidden_size), jnp.float32, -s, s),
        w_hh=jax.random.uniform(k3, (3, hidden_size, hidden_size), jnp.float32, -s, s),
        b_ih=jax.random.uniform(k4, (3, 1, hidden_size), jnp.float32, -s, s),
        b_hh=jax.random.uniform(k5, (3, 1, hidden_size), jnp.float32, -s, s),
    )


def reference_forward(questions, question_length, params):
    """Pure-JAX reference (same math as torch GRU on a packed sequence)."""
    emb = jnp.take(params["embed"], questions.astype(jnp.int32), axis=0)
    B, T, _ = emb.shape
    H = params["w_hh"].shape[-1]
    h = jnp.zeros((B, H), jnp.float32)
    hid = jnp.zeros((B, H), jnp.float32)
    outs = []
    lens = question_length.astype(jnp.int32)
    for t in range(T):
        x_t = emb[:, t, :].astype(jnp.float32)
        i_r = x_t @ params["w_ih"][0] + params["b_ih"][0]
        i_z = x_t @ params["w_ih"][1] + params["b_ih"][1]
        i_n = x_t @ params["w_ih"][2] + params["b_ih"][2]
        h_r = h @ params["w_hh"][0] + params["b_hh"][0]
        h_z = h @ params["w_hh"][1] + params["b_hh"][1]
        h_n = h @ params["w_hh"][2] + params["b_hh"][2]
        r = jax.nn.sigmoid(i_r + h_r)
        z = jax.nn.sigmoid(i_z + h_z)
        n = jnp.tanh(i_n + r * h_n)
        h_new = (1.0 - z) * n + z * h
        valid = (lens > t)[:, None]
        h = jnp.where(valid, h_new, h)
        outs.append(jnp.where(valid, h_new, 0.0))
        hid = jnp.where((lens == t + 1)[:, None], h_new, hid)
    return hid[:, None, :], jnp.stack(outs, axis=1)


if __name__ == "__main__":
    # Small shapes consistent with the module:
    #   vocab_nums=50 (embedding rows), vocab_size=32 (embedding dim == GRU input),
    #   hidden_size=32, batch=2, seq=8.
    B, T = 2, 8
    vocab_nums, vocab_size, hidden_size = 50, 32, 32

    key = jax.random.PRNGKey(0)
    kp, kq = jax.random.split(key)
    params = init_params(kp, vocab_nums, vocab_size, hidden_size)

    questions = jax.random.randint(kq, (B, T), 0, vocab_nums, dtype=jnp.int32)
    question_length = jnp.array([T, 5], dtype=jnp.int32)  # max(length) == T

    hidden, outputs = jax.jit(question_embedding_forward)(questions, question_length, params)
    hidden, outputs = jax.block_until_ready((hidden, outputs))

    ref_hidden, ref_outputs = reference_forward(questions, question_length, params)
    assert hidden.shape == (B, 1, hidden_size)
    assert outputs.shape == (B, T, hidden_size)
    assert jnp.allclose(hidden, ref_hidden, atol=1e-5, rtol=1e-5)
    assert jnp.allclose(outputs, ref_outputs, atol=1e-5, rtol=1e-5)

    print("KERNEL_OK")
</pallas_src>

<mosaic_0001>
module attributes {stable_mosaic.version = 11 : i64} {
  func.func @gru_packed_kernel(%arg0: memref<8x8x32xf32, #tpu.memory_space<vmem>>, %arg1: memref<8x1xi32, #tpu.memory_space<vmem>>, %arg2: memref<32x96xf32, #tpu.memory_space<vmem>>, %arg3: memref<32x96xf32, #tpu.memory_space<vmem>>, %arg4: memref<1x96xf32, #tpu.memory_space<vmem>>, %arg5: memref<1x96xf32, #tpu.memory_space<vmem>>, %arg6: memref<8x8x32xf32, #tpu.memory_space<vmem>>, %arg7: memref<8x32xf32, #tpu.memory_space<vmem>>, %arg8: memref<8x8x96xf32, #tpu.memory_space<vmem>>) attributes {dimension_semantics = [], scalar_prefetch = 0 : i64, scratch_operands = 1 : i64, tpu.core_type = #tpu.core_type<tc>} {
    %c0 = arith.constant 0 : index
    %c0_0 = arith.constant 0 : index
    %c0_1 = arith.constant 0 : index
    %0 = vector.load %arg0[%c0, %c0_0, %c0_1] : memref<8x8x32xf32, #tpu.memory_space<vmem>>, vector<8x8x32xf32>
    %1 = vector.shape_cast %0 : vector<8x8x32xf32> to vector<64x32xf32>
    %c0_2 = arith.constant 0 : index
    %c0_3 = arith.constant 0 : index
    %2 = vector.load %arg2[%c0_2, %c0_3] : memref<32x96xf32, #tpu.memory_space<vmem>>, vector<32x96xf32>
    %cst = arith.constant dense<0.000000e+00> : vector<64x96xf32>
    %3 = tpu.matmul %1, %2, %cst {dimension_numbers = #tpu.dot_dimension_numbers<[1], [0], [0], [1], [0, 0, 1, 1], [], []>} : vector<64x32xf32>, vector<32x96xf32>, vector<64x96xf32> -> vector<64x96xf32>
    %c0_4 = arith.constant 0 : index
    %c0_5 = arith.constant 0 : index
    %4 = vector.load %arg4[%c0_4, %c0_5] : memref<1x96xf32, #tpu.memory_space<vmem>>, vector<1x96xf32>
    %5 = vector.broadcast %4 : vector<1x96xf32> to vector<64x96xf32>
    %6 = arith.addf %3, %5 : vector<64x96xf32>
    %7 = vector.shape_cast %6 : vector<64x96xf32> to vector<8x8x96xf32>
    %c0_6 = arith.constant 0 : index
    %c0_7 = arith.constant 0 : index
    %c0_8 = arith.constant 0 : index
    %8 = vector.load %arg8[%c0_6, %c0_7, %c0_8] : memref<8x8x96xf32, #tpu.memory_space<vmem>>, vector<8x8x96xf32>
    tpu.vector_store %arg8[%c0_6, %c0_7, %c0_8], %7 {strides = array<i32>} : memref<8x8x96xf32, #tpu.memory_space<vmem>>, vector<8x8x96xf32>,
    %c0_9 = arith.constant 0 : index
    %c0_10 = arith.constant 0 : index
    %9 = vector.load %arg3[%c0_9, %c0_10] : memref<32x96xf32, #tpu.memory_space<vmem>>, vector<32x96xf32>
    %c0_11 = arith.constant 0 : index
    %c0_12 = arith.constant 0 : index
    %10 = vector.load %arg5[%c0_11, %c0_12] : memref<1x96xf32, #tpu.memory_space<vmem>>, vector<1x96xf32>
    %11 = vector.shape_cast %10 : vector<1x96xf32> to vector<1x96xf32>
    %12 = vector.broadcast %11 : vector<1x96xf32> to vector<8x96xf32>
    %c0_13 = arith.constant 0 : index
    %c0_14 = arith.constant 0 : index
    %13 = vector.load %arg1[%c0_13, %c0_14] : memref<8x1xi32, #tpu.memory_space<vmem>>, vector<8x1xi32>
    %cst_15 = arith.constant 0.000000e+00 : f32
    %14 = vector.broadcast %cst_15 : f32 to vector<8x32xf32>
    %c0_i32 = arith.constant 0 : i32
    %15 = arith.index_cast %c0_i32 : i32 to index
    %c0_16 = arith.constant 0 : index
    %c0_17 = arith.constant 0 : index
    %16 = vector.load %arg8[%15, %c0_16, %c0_17] : memref<8x8x96xf32, #tpu.memory_space<vmem>>, vector<1x8x96xf32>
    %17 = vector.shape_cast %16 : vector<1x8x96xf32> to vector<8x96xf32>
    %cst_18 = arith.constant dense<0.000000e+00> : vector<8x96xf32>
    %18 = tpu.matmul %14, %9, %cst_18 {dimension_numbers = #tpu.dot_dimension_numbers<[1], [0], [0], [1], [0, 0, 1, 1], [], []>} : vector<8x32xf32>, vector<32x96xf32>, vector<8x96xf32> -> vector<8x96xf32>
    %19 = arith.addf %18, %12 : vector<8x96xf32>
    %20 = vector.extract_strided_slice %17 {offsets = [0, 0], sizes = [8, 32], strides = [1, 1]} : vector<8x96xf32> to vector<8x32xf32>
    %21 = vector.extract_strided_slice %19 {offsets = [0, 0], sizes = [8, 32], strides = [1, 1]} : vector<8x96xf32> to vector<8x32xf32>
    %22 = arith.addf %20, %21 : vector<8x32xf32>
    %23 = arith.negf %22 : vector<8x32xf32>
    %24 = math.exp %23 : vector<8x32xf32>
    %cst_19 = arith.constant 1.000000e+00 : f32
    %25 = vector.broadcast %cst_19 : f32 to vector<8x32xf32>
    %26 = arith.addf %25, %24 : vector<8x32xf32>
    %27 = arith.divf %25, %26 : vector<8x32xf32>
    %28 = vector.extract_strided_slice %17 {offsets = [0, 32], sizes = [8, 32], strides = [1, 1]} : vector<8x96xf32> to vector<8x32xf32>
    %29 = vector.extract_strided_slice %19 {offsets = [0, 32], sizes = [8, 32], strides = [1, 1]} : vector<8x96xf32> to vector<8x32xf32>
    %30 = arith.addf %28, %29 : vector<8x32xf32>
    %31 = arith.negf %30 : vector<8x32xf32>
    %32 = math.exp %31 : vector<8x32xf32>
    %cst_20 = arith.constant 1.000000e+00 : f32
    %33 = vector.broadcast %cst_20 : f32 to vector<8x32xf32>
    %34 = arith.addf %33, %32 : vector<8x32xf32>
    %35 = arith.divf %33, %34 : vector<8x32xf32>
    %36 = vector.extract_strided_slice %17 {offsets = [0, 64], sizes = [8, 32], strides = [1, 1]} : vector<8x96xf32> to vector<8x32xf32>
    %37 = vector.extract_strided_slice %19 {offsets = [0, 64], sizes = [8, 32], strides = [1, 1]} : vector<8x96xf32> to vector<8x32xf32>
    %38 = arith.mulf %27, %37 : vector<8x32xf32>
    %39 = arith.addf %36, %38 : vector<8x32xf32>
    %40 = math.tanh %39 : vector<8x32xf32>
    %cst_21 = arith.constant 1.000000e+00 : f32
    %41 = vector.broadcast %cst_21 : f32 to vector<8x32xf32>
    %42 = arith.subf %41, %35 : vector<8x32xf32>
    %43 = arith.mulf %42, %40 : vector<8x32xf32>
    %44 = arith.mulf %35, %14 : vector<8x32xf32>
    %45 = arith.addf %43, %44 : vector<8x32xf32>
    %46 = vector.broadcast %c0_i32 : i32 to vector<8x1xi32>
    %47 = arith.cmpi sgt, %13, %46 : vector<8x1xi32>
    %cst_22 = arith.constant 0.000000e+00 : f32
    %48 = vector.shape_cast %47 : vector<8x1xi1> to vector<8x1xi1>
    %49 = vector.broadcast %48 : vector<8x1xi1> to vector<8x32xi1>
    %50 = vector.broadcast %cst_22 : f32 to vector<8x32xf32>
    %51 = arith.select %49, %45, %50 : vector<8x32xi1>, vector<8x32xf32>
    %52 = arith.index_cast %c0_i32 : i32 to index
    %c0_23 = arith.constant 0 : index
    %c0_24 = arith.constant 0 : index
    %53 = vector.load %arg6[%52, %c0_23, %c0_24] : memref<8x8x32xf32, #tpu.memory_space<vmem>>, vector<1x8x32xf32>
    %54 = vector.shape_cast %53 : vector<1x8x32xf32> to vector<8x32xf32>
    %55 = vector.shape_cast %51 : vector<8x32xf32> to vector<1x8x32xf32>
    tpu.vector_store %arg6[%52, %c0_23, %c0_24], %55 {strides = array<i32>} : memref<8x8x32xf32, #tpu.memory_space<vmem>>, vector<1x8x32xf32>,
    %56 = vector.shape_cast %47 : vector<8x1xi1> to vector<8x1xi1>
    %57 = vector.broadcast %56 : vector<8x1xi1> to vector<8x32xi1>
    %58 = arith.select %57, %45, %14 : vector<8x32xi1>, vector<8x32xf32>
    %c1_i32 = arith.constant 1 : i32
    %59 = arith.addi %c0_i32, %c1_i32 : i32
    %60 = vector.broadcast %59 : i32 to vector<8x1xi32>
    %61 = arith.cmpi eq, %13, %60 : vector<8x1xi32>
    %62 = vector.shape_cast %61 : vector<8x1xi1> to vector<8x1xi1>
    %63 = vector.broadcast %62 : vector<8x1xi1> to vector<8x32xi1>
    %64 = arith.select %63, %45, %14 : vector<8x32xi1>, vector<8x32xf32>
    %c1_i32_25 = arith.constant 1 : i32
    %65 = arith.index_cast %c1_i32_25 : i32 to index
    %c0_26 = arith.constant 0 : index
    %c0_27 = arith.constant 0 : index
    %66 = vector.load %arg8[%65, %c0_26, %c0_27] : memref<8x8x96xf32, #tpu.memory_space<vmem>>, vector<1x8x96xf32>
    %67 = vector.shape_cast %66 : vector<1x8x96xf32> to vector<8x96xf32>
    %cst_28 = arith.constant dense<0.000000e+00> : vector<8x96xf32>
    %68 = tpu.matmul %58, %9, %cst_28 {dimension_numbers = #tpu.dot_dimension_numbers<[1], [0], [0], [1], [0, 0, 1, 1], [], []>} : vector<8x32xf32>, vector<32x96xf32>, vector<8x96xf32> -> vector<8x96xf32>
    %69 = arith.addf %68, %12 : vector<8x96xf32>
    %70 = vector.extract_strided_slice %67 {offsets = [0, 0], sizes = [8, 32], strides = [1, 1]} : vector<8x96xf32> to vector<8x32xf32>
    %71 = vector.extract_strided_slice %69 {offsets = [0, 0], sizes = [8, 32], strides = [1, 1]} : vector<8x96xf32> to vector<8x32xf32>
    %72 = arith.addf %70, %71 : vector<8x32xf32>
    %73 = arith.negf %72 : vector<8x32xf32>
    %74 = math.exp %73 : vector<8x32xf32>
    %cst_29 = arith.constant 1.000000e+00 : f32
    %75 = vector.broadcast %cst_29 : f32 to vector<8x32xf32>
    %76 = arith.addf %75, %74 : vector<8x32xf32>
    %77 = arith.divf %75, %76 : vector<8x32xf32>
    %78 = vector.extract_strided_slice %67 {offsets = [0, 32], sizes = [8, 32], strides = [1, 1]} : vector<8x96xf32> to vector<8x32xf32>
    %79 = vector.extract_strided_slice %69 {offsets = [0, 32], sizes = [8, 32], strides = [1, 1]} : vector<8x96xf32> to vector<8x32xf32>
    %80 = arith.addf %78, %79 : vector<8x32xf32>
    %81 = arith.negf %80 : vector<8x32xf32>
    %82 = math.exp %81 : vector<8x32xf32>
    %cst_30 = arith.constant 1.000000e+00 : f32
    %83 = vector.broadcast %cst_30 : f32 to vector<8x32xf32>
    %84 = arith.addf %83, %82 : vector<8x32xf32>
    %85 = arith.divf %83, %84 : vector<8x32xf32>
    %86 = vector.extract_strided_slice %67 {offsets = [0, 64], sizes = [8, 32], strides = [1, 1]} : vector<8x96xf32> to vector<8x32xf32>
    %87 = vector.extract_strided_slice %69 {offsets = [0, 64], sizes = [8, 32], strides = [1, 1]} : vector<8x96xf32> to vector<8x32xf32>
    %88 = arith.mulf %77, %87 : vector<8x32xf32>
    %89 = arith.addf %86, %88 : vector<8x32xf32>
    %90 = math.tanh %89 : vector<8x32xf32>
    %cst_31 = arith.constant 1.000000e+00 : f32
    %91 = vector.broadcast %cst_31 : f32 to vector<8x32xf32>
    %92 = arith.subf %91, %85 : vector<8x32xf32>
    %93 = arith.mulf %92, %90 : vector<8x32xf32>
    %94 = arith.mulf %85, %58 : vector<8x32xf32>
    %95 = arith.addf %93, %94 : vector<8x32xf32>
    %96 = vector.broadcast %c1_i32_25 : i32 to vector<8x1xi32>
    %97 = arith.cmpi sgt, %13, %96 : vector<8x1xi32>
    %cst_32 = arith.constant 0.000000e+00 : f32
    %98 = vector.shape_cast %97 : vector<8x1xi1> to vector<8x1xi1>
    %99 = vector.broadcast %98 : vector<8x1xi1> to vector<8x32xi1>
    %100 = vector.broadcast %cst_32 : f32 to vector<8x32xf32>
    %101 = arith.select %99, %95, %100 : vector<8x32xi1>, vector<8x32xf32>
    %102 = arith.index_cast %c1_i32_25 : i32 to index
    %c0_33 = arith.constant 0 : index
    %c0_34 = arith.constant 0 : index
    %103 = vector.load %arg6[%102, %c0_33, %c0_34] : memref<8x8x32xf32, #tpu.memory_space<vmem>>, vector<1x8x32xf32>
    %104 = vector.shape_cast %103 : vector<1x8x32xf32> to vector<8x32xf32>
    %105 = vector.shape_cast %101 : vector<8x32xf32> to vector<1x8x32xf32>
    tpu.vector_store %arg6[%102, %c0_33, %c0_34], %105 {strides = array<i32>} : memref<8x8x32xf32, #tpu.memory_space<vmem>>, vector<1x8x32xf32>,
    %106 = vector.shape_cast %97 : vector<8x1xi1> to vector<8x1xi1>
    %107 = vector.broadcast %106 : vector<8x1xi1> to vector<8x32xi1>
    %108 = arith.select %107, %95, %58 : vector<8x32xi1>, vector<8x32xf32>
    %c1_i32_35 = arith.constant 1 : i32
    %109 = arith.addi %c1_i32_25, %c1_i32_35 : i32
    %110 = vector.broadcast %109 : i32 to vector<8x1xi32>
    %111 = arith.cmpi eq, %13, %110 : vector<8x1xi32>
    %112 = vector.shape_cast %111 : vector<8x1xi1> to vector<8x1xi1>
    %113 = vector.broadcast %112 : vector<8x1xi1> to vector<8x32xi1>
    %114 = arith.select %113, %95, %64 : vector<8x32xi1>, vector<8x32xf32>
    %c2_i32 = arith.constant 2 : i32
    %115 = arith.index_cast %c2_i32 : i32 to index
    %c0_36 = arith.constant 0 : index
    %c0_37 = arith.constant 0 : index
    %116 = vector.load %arg8[%115, %c0_36, %c0_37] : memref<8x8x96xf32, #tpu.memory_space<vmem>>, vector<1x8x96xf32>
    %117 = vector.shape_cast %116 : vector<1x8x96xf32> to vector<8x96xf32>
    %cst_38 = arith.constant dense<0.000000e+00> : vector<8x96xf32>
    %118 = tpu.matmul %108, %9, %cst_38 {dimension_numbers = #tpu.dot_dimension_numbers<[1], [0], [0], [1], [0, 0, 1, 1], [], []>} : vector<8x32xf32>, vector<32x96xf32>, vector<8x96xf32> -> vector<8x96xf32>
    %119 = arith.addf %118, %12 : vector<8x96xf32>
    %120 = vector.extract_strided_slice %117 {offsets = [0, 0], sizes = [8, 32], strides = [1, 1]} : vector<8x96xf32> to vector<8x32xf32>
    %121 = vector.extract_strided_slice %119 {offsets = [0, 0], sizes = [8, 32], strides = [1, 1]} : vector<8x96xf32> to vector<8x32xf32>
    %122 = arith.addf %120, %121 : vector<8x32xf32>
    %123 = arith.negf %122 : vector<8x32xf32>
    %124 = math.exp %123 : vector<8x32xf32>
    %cst_39 = arith.constant 1.000000e+00 : f32
    %125 = vector.broadcast %cst_39 : f32 to vector<8x32xf32>
    %126 = arith.addf %125, %124 : vector<8x32xf32>
    %127 = arith.divf %125, %126 : vector<8x32xf32>
    %128 = vector.extract_strided_slice %117 {offsets = [0, 32], sizes = [8, 32], strides = [1, 1]} : vector<8x96xf32> to vector<8x32xf32>
    %129 = vector.extract_strided_slice %119 {offsets = [0, 32], sizes = [8, 32], strides = [1, 1]} : vector<8x96xf32> to vector<8x32xf32>
    %130 = arith.addf %128, %129 : vector<8x32xf32>
    %131 = arith.negf %130 : vector<8x32xf32>
    %132 = math.exp %131 : vector<8x32xf32>
    %cst_40 = arith.constant 1.000000e+00 : f32
    %133 = vector.broadcast %cst_40 : f32 to vector<8x32xf32>
    %134 = arith.addf %133, %132 : vector<8x32xf32>
    %135 = arith.divf %133, %134 : vector<8x32xf32>
    %136 = vector.extract_strided_slice %117 {offsets = [0, 64], sizes = [8, 32], strides = [1, 1]} : vector<8x96xf32> to vector<8x32xf32>
    %137 = vector.extract_strided_slice %119 {offsets = [0, 64], sizes = [8, 32], strides = [1, 1]} : vector<8x96xf32> to vector<8x32xf32>
    %138 = arith.mulf %127, %137 : vector<8x32xf32>
    %139 = arith.addf %136, %138 : vector<8x32xf32>
    %140 = math.tanh %139 : vector<8x32xf32>
    %cst_41 = arith.constant 1.000000e+00 : f32
    %141 = vector.broadcast %cst_41 : f32 to vector<8x32xf32>
    %142 = arith.subf %141, %135 : vector<8x32xf32>
    %143 = arith.mulf %142, %140 : vector<8x32xf32>
    %144 = arith.mulf %135, %108 : vector<8x32xf32>
    %145 = arith.addf %143, %144 : vector<8x32xf32>
    %146 = vector.broadcast %c2_i32 : i32 to vector<8x1xi32>
    %147 = arith.cmpi sgt, %13, %146 : vector<8x1xi32>
    %cst_42 = arith.constant 0.000000e+00 : f32
    %148 = vector.shape_cast %147 : vector<8x1xi1> to vector<8x1xi1>
    %149 = vector.broadcast %148 : vector<8x1xi1> to vector<8x32xi1>
    %150 = vector.broadcast %cst_42 : f32 to vector<8x32xf32>
    %151 = arith.select %149, %145, %150 : vector<8x32xi1>, vector<8x32xf32>
    %152 = arith.index_cast %c2_i32 : i32 to index
    %c0_43 = arith.constant 0 : index
    %c0_44 = arith.constant 0 : index
    %153 = vector.load %arg6[%152, %c0_43, %c0_44] : memref<8x8x32xf32, #tpu.memory_space<vmem>>, vector<1x8x32xf32>
    %154 = vector.shape_cast %153 : vector<1x8x32xf32> to vector<8x32xf32>
    %155 = vector.shape_cast %151 : vector<8x32xf32> to vector<1x8x32xf32>
    tpu.vector_store %arg6[%152, %c0_43, %c0_44], %155 {strides = array<i32>} : memref<8x8x32xf32, #tpu.memory_space<vmem>>, vector<1x8x32xf32>,
    %156 = vector.shape_cast %147 : vector<8x1xi1> to vector<8x1xi1>
    %157 = vector.broadcast %156 : vector<8x1xi1> to vector<8x32xi1>
    %158 = arith.select %157, %145, %108 : vector<8x32xi1>, vector<8x32xf32>
    %c1_i32_45 = arith.constant 1 : i32
    %159 = arith.addi %c2_i32, %c1_i32_45 : i32
    %160 = vector.broadcast %159 : i32 to vector<8x1xi32>
    %161 = arith.cmpi eq, %13, %160 : vector<8x1xi32>
    %162 = vector.shape_cast %161 : vector<8x1xi1> to vector<8x1xi1>
    %163 = vector.broadcast %162 : vector<8x1xi1> to vector<8x32xi1>
    %164 = arith.select %163, %145, %114 : vector<8x32xi1>, vector<8x32xf32>
    %c3_i32 = arith.constant 3 : i32
    %165 = arith.index_cast %c3_i32 : i32 to index
    %c0_46 = arith.constant 0 : index
    %c0_47 = arith.constant 0 : index
    %166 = vector.load %arg8[%165, %c0_46, %c0_47] : memref<8x8x96xf32, #tpu.memory_space<vmem>>, vector<1x8x96xf32>
    %167 = vector.shape_cast %166 : vector<1x8x96xf32> to vector<8x96xf32>
    %cst_48 = arith.constant dense<0.000000e+00> : vector<8x96xf32>
    %168 = tpu.matmul %158, %9, %cst_48 {dimension_numbers = #tpu.dot_dimension_numbers<[1], [0], [0], [1], [0, 0, 1, 1], [], []>} : vector<8x32xf32>, vector<32x96xf32>, vector<8x96xf32> -> vector<8x96xf32>
    %169 = arith.addf %168, %12 : vector<8x96xf32>
    %170 = vector.extract_strided_slice %167 {offsets = [0, 0], sizes = [8, 32], strides = [1, 1]} : vector<8x96xf32> to vector<8x32xf32>
    %171 = vector.extract_strided_slice %169 {offsets = [0, 0], sizes = [8, 32], strides = [1, 1]} : vector<8x96xf32> to vector<8x32xf32>
    %172 = arith.addf %170, %171 : vector<8x32xf32>
    %173 = arith.negf %172 : vector<8x32xf32>
    %174 = math.exp %173 : vector<8x32xf32>
    %cst_49 = arith.constant 1.000000e+00 : f32
    %175 = vector.broadcast %cst_49 : f32 to vector<8x32xf32>
    %176 = arith.addf %175, %174 : vector<8x32xf32>
    %177 = arith.divf %175, %176 : vector<8x32xf32>
    %178 = vector.extract_strided_slice %167 {offsets = [0, 32], sizes = [8, 32], strides = [1, 1]} : vector<8x96xf32> to vector<8x32xf32>
    %179 = vector.extract_strided_slice %169 {offsets = [0, 32], sizes = [8, 32], strides = [1, 1]} : vector<8x96xf32> to vector<8x32xf32>
    %180 = arith.addf %178, %179 : vector<8x32xf32>
    %181 = arith.negf %180 : vector<8x32xf32>
    %182 = math.exp %181 : vector<8x32xf32>
    %cst_50 = arith.constant 1.000000e+00 : f32
    %183 = vector.broadcast %cst_50 : f32 to vector<8x32xf32>
    %184 = arith.addf %183, %182 : vector<8x32xf32>
    %185 = arith.divf %183, %184 : vector<8x32xf32>
    %186 = vector.extract_strided_slice %167 {offsets = [0, 64], sizes = [8, 32], strides = [1, 1]} : vector<8x96xf32> to vector<8x32xf32>
    %187 = vector.extract_strided_slice %169 {offsets = [0, 64], sizes = [8, 32], strides = [1, 1]} : vector<8x96xf32> to vector<8x32xf32>
    %188 = arith.mulf %177, %187 : vector<8x32xf32>
    %189 = arith.addf %186, %188 : vector<8x32xf32>
    %190 = math.tanh %189 : vector<8x32xf32>
    %cst_51 = arith.constant 1.000000e+00 : f32
    %191 = vector.broadcast %cst_51 : f32 to vector<8x32xf32>
    %192 = arith.subf %191, %185 : vector<8x32xf32>
    %193 = arith.mulf %192, %190 : vector<8x32xf32>
    %194 = arith.mulf %185, %158 : vector<8x32xf32>
    %195 = arith.addf %193, %194 : vector<8x32xf32>
    %196 = vector.broadcast %c3_i32 : i32 to vector<8x1xi32>
    %197 = arith.cmpi sgt, %13, %196 : vector<8x1xi32>
    %cst_52 = arith.constant 0.000000e+00 : f32
    %198 = vector.shape_cast %197 : vector<8x1xi1> to vector<8x1xi1>
    %199 = vector.broadcast %198 : vector<8x1xi1> to vector<8x32xi1>
    %200 = vector.broadcast %cst_52 : f32 to vector<8x32xf32>
    %201 = arith.select %199, %195, %200 : vector<8x32xi1>, vector<8x32xf32>
    %202 = arith.index_cast %c3_i32 : i32 to index
    %c0_53 = arith.constant 0 : index
    %c0_54 = arith.constant 0 : index
    %203 = vector.load %arg6[%202, %c0_53, %c0_54] : memref<8x8x32xf32, #tpu.memory_space<vmem>>, vector<1x8x32xf32>
    %204 = vector.shape_cast %203 : vector<1x8x32xf32> to vector<8x32xf32>
    %205 = vector.shape_cast %201 : vector<8x32xf32> to vector<1x8x32xf32>
    tpu.vector_store %arg6[%202, %c0_53, %c0_54], %205 {strides = array<i32>} : memref<8x8x32xf32, #tpu.memory_space<vmem>>, vector<1x8x32xf32>,
    %206 = vector.shape_cast %197 : vector<8x1xi1> to vector<8x1xi1>
    %207 = vector.broadcast %206 : vector<8x1xi1> to vector<8x32xi1>
    %208 = arith.select %207, %195, %158 : vector<8x32xi1>, vector<8x32xf32>
    %c1_i32_55 = arith.constant 1 : i32
    %209 = arith.addi %c3_i32, %c1_i32_55 : i32
    %210 = vector.broadcast %209 : i32 to vector<8x1xi32>
    %211 = arith.cmpi eq, %13, %210 : vector<8x1xi32>
    %212 = vector.shape_cast %211 : vector<8x1xi1> to vector<8x1xi1>
    %213 = vector.broadcast %212 : vector<8x1xi1> to vector<8x32xi1>
    %214 = arith.select %213, %195, %164 : vector<8x32xi1>, vector<8x32xf32>
    %c4_i32 = arith.constant 4 : i32
    %215 = arith.index_cast %c4_i32 : i32 to index
    %c0_56 = arith.constant 0 : index
    %c0_57 = arith.constant 0 : index
    %216 = vector.load %arg8[%215, %c0_56, %c0_57] : memref<8x8x96xf32, #tpu.memory_space<vmem>>, vector<1x8x96xf32>
    %217 = vector.shape_cast %216 : vector<1x8x96xf32> to vector<8x96xf32>
    %cst_58 = arith.constant dense<0.000000e+00> : vector<8x96xf32>
    %218 = tpu.matmul %208, %9, %cst_58 {dimension_numbers = #tpu.dot_dimension_numbers<[1], [0], [0], [1], [0, 0, 1, 1], [], []>} : vector<8x32xf32>, vector<32x96xf32>, vector<8x96xf32> -> vector<8x96xf32>
    %219 = arith.addf %218, %12 : vector<8x96xf32>
    %220 = vector.extract_strided_slice %217 {offsets = [0, 0], sizes = [8, 32], strides = [1, 1]} : vector<8x96xf32> to vector<8x32xf32>
    %221 = vector.extract_strided_slice %219 {offsets = [0, 0], sizes = [8, 32], strides = [1, 1]} : vector<8x96xf32> to vector<8x32xf32>
    %222 = arith.addf %220, %221 : vector<8x32xf32>
    %223 = arith.negf %222 : vector<8x32xf32>
    %224 = math.exp %223 : vector<8x32xf32>
    %cst_59 = arith.constant 1.000000e+00 : f32
    %225 = vector.broadcast %cst_59 : f32 to vector<8x32xf32>
    %226 = arith.addf %225, %224 : vector<8x32xf32>
    %227 = arith.divf %225, %226 : vector<8x32xf32>
    %228 = vector.extract_strided_slice %217 {offsets = [0, 32], sizes = [8, 32], strides = [1, 1]} : vector<8x96xf32> to vector<8x32xf32>
    %229 = vector.extract_strided_slice %219 {offsets = [0, 32], sizes = [8, 32], strides = [1, 1]} : vector<8x96xf32> to vector<8x32xf32>
    %230 = arith.addf %228, %229 : vector<8x32xf32>
    %231 = arith.negf %230 : vector<8x32xf32>
    %232 = math.exp %231 : vector<8x32xf32>
    %cst_60 = arith.constant 1.000000e+00 : f32
    %233 = vector.broadcast %cst_60 : f32 to vector<8x32xf32>
    %234 = arith.addf %233, %232 : vector<8x32xf32>
    %235 = arith.divf %233, %234 : vector<8x32xf32>
    %236 = vector.extract_strided_slice %217 {offsets = [0, 64], sizes = [8, 32], strides = [1, 1]} : vector<8x96xf32> to vector<8x32xf32>
    %237 = vector.extract_strided_slice %219 {offsets = [0, 64], sizes = [8, 32], strides = [1, 1]} : vector<8x96xf32> to vector<8x32xf32>
    %238 = arith.mulf %227, %237 : vector<8x32xf32>
    %239 = arith.addf %236, %238 : vector<8x32xf32>
    %240 = math.tanh %239 : vector<8x32xf32>
    %cst_61 = arith.constant 1.000000e+00 : f32
    %241 = vector.broadcast %cst_61 : f32 to vector<8x32xf32>
    %242 = arith.subf %241, %235 : vector<8x32xf32>
    %243 = arith.mulf %242, %240 : vector<8x32xf32>
    %244 = arith.mulf %235, %208 : vector<8x32xf32>
    %245 = arith.addf %243, %244 : vector<8x32xf32>
    %246 = vector.broadcast %c4_i32 : i32 to vector<8x1xi32>
    %247 = arith.cmpi sgt, %13, %246 : vector<8x1xi32>
    %cst_62 = arith.constant 0.000000e+00 : f32
    %248 = vector.shape_cast %247 : vector<8x1xi1> to vector<8x1xi1>
    %249 = vector.broadcast %248 : vector<8x1xi1> to vector<8x32xi1>
    %250 = vector.broadcast %cst_62 : f32 to vector<8x32xf32>
    %251 = arith.select %249, %245, %250 : vector<8x32xi1>, vector<8x32xf32>
    %252 = arith.index_cast %c4_i32 : i32 to index
    %c0_63 = arith.constant 0 : index
    %c0_64 = arith.constant 0 : index
    %253 = vector.load %arg6[%252, %c0_63, %c0_64] : memref<8x8x32xf32, #tpu.memory_space<vmem>>, vector<1x8x32xf32>
    %254 = vector.shape_cast %253 : vector<1x8x32xf32> to vector<8x32xf32>
    %255 = vector.shape_cast %251 : vector<8x32xf32> to vector<1x8x32xf32>
    tpu.vector_store %arg6[%252, %c0_63, %c0_64], %255 {strides = array<i32>} : memref<8x8x32xf32, #tpu.memory_space<vmem>>, vector<1x8x32xf32>,
    %256 = vector.shape_cast %247 : vector<8x1xi1> to vector<8x1xi1>
    %257 = vector.broadcast %256 : vector<8x1xi1> to vector<8x32xi1>
    %258 = arith.select %257, %245, %208 : vector<8x32xi1>, vector<8x32xf32>
    %c1_i32_65 = arith.constant 1 : i32
    %259 = arith.addi %c4_i32, %c1_i32_65 : i32
    %260 = vector.broadcast %259 : i32 to vector<8x1xi32>
    %261 = arith.cmpi eq, %13, %260 : vector<8x1xi32>
    %262 = vector.shape_cast %261 : vector<8x1xi1> to vector<8x1xi1>
    %263 = vector.broadcast %262 : vector<8x1xi1> to vector<8x32xi1>
    %264 = arith.select %263, %245, %214 : vector<8x32xi1>, vector<8x32xf32>
    %c5_i32 = arith.constant 5 : i32
    %265 = arith.index_cast %c5_i32 : i32 to index
    %c0_66 = arith.constant 0 : index
    %c0_67 = arith.constant 0 : index
    %266 = vector.load %arg8[%265, %c0_66, %c0_67] : memref<8x8x96xf32, #tpu.memory_space<vmem>>, vector<1x8x96xf32>
    %267 = vector.shape_cast %266 : vector<1x8x96xf32> to vector<8x96xf32>
    %cst_68 = arith.constant dense<0.000000e+00> : vector<8x96xf32>
    %268 = tpu.matmul %258, %9, %cst_68 {dimension_numbers = #tpu.dot_dimension_numbers<[1], [0], [0], [1], [0, 0, 1, 1], [], []>} : vector<8x32xf32>, vector<32x96xf32>, vector<8x96xf32> -> vector<8x96xf32>
    %269 = arith.addf %268, %12 : vector<8x96xf32>
    %270 = vector.extract_strided_slice %267 {offsets = [0, 0], sizes = [8, 32], strides = [1, 1]} : vector<8x96xf32> to vector<8x32xf32>
    %271 = vector.extract_strided_slice %269 {offsets = [0, 0], sizes = [8, 32], strides = [1, 1]} : vector<8x96xf32> to vector<8x32xf32>
    %272 = arith.addf %270, %271 : vector<8x32xf32>
    %273 = arith.negf %272 : vector<8x32xf32>
    %274 = math.exp %273 : vector<8x32xf32>
    %cst_69 = arith.constant 1.000000e+00 : f32
    %275 = vector.broadcast %cst_69 : f32 to vector<8x32xf32>
    %276 = arith.addf %275, %274 : vector<8x32xf32>
    %277 = arith.divf %275, %276 : vector<8x32xf32>
    %278 = vector.extract_strided_slice %267 {offsets = [0, 32], sizes = [8, 32], strides = [1, 1]} : vector<8x96xf32> to vector<8x32xf32>
    %279 = vector.extract_strided_slice %269 {offsets = [0, 32], sizes = [8, 32], strides = [1, 1]} : vector<8x96xf32> to vector<8x32xf32>
    %280 = arith.addf %278, %279 : vector<8x32xf32>
    %281 = arith.negf %280 : vector<8x32xf32>
    %282 = math.exp %281 : vector<8x32xf32>
    %cst_70 = arith.constant 1.000000e+00 : f32
    %283 = vector.broadcast %cst_70 : f32 to vector<8x32xf32>
    %284 = arith.addf %283, %282 : vector<8x32xf32>
    %285 = arith.divf %283, %284 : vector<8x32xf32>
    %286 = vector.extract_strided_slice %267 {offsets = [0, 64], sizes = [8, 32], strides = [1, 1]} : vector<8x96xf32> to vector<8x32xf32>
    %287 = vector.extract_strided_slice %269 {offsets = [0, 64], sizes = [8, 32], strides = [1, 1]} : vector<8x96xf32> to vector<8x32xf32>
    %288 = arith.mulf %277, %287 : vector<8x32xf32>
    %289 = arith.addf %286, %288 : vector<8x32xf32>
    %290 = math.tanh %289 : vector<8x32xf32>
    %cst_71 = arith.constant 1.000000e+00 : f32
    %291 = vector.broadcast %cst_71 : f32 to vector<8x32xf32>
    %292 = arith.subf %291, %285 : vector<8x32xf32>
    %293 = arith.mulf %292, %290 : vector<8x32xf32>
    %294 = arith.mulf %285, %258 : vector<8x32xf32>
    %295 = arith.addf %293, %294 : vector<8x32xf32>
    %296 = vector.broadcast %c5_i32 : i32 to vector<8x1xi32>
    %297 = arith.cmpi sgt, %13, %296 : vector<8x1xi32>
    %cst_72 = arith.constant 0.000000e+00 : f32
    %298 = vector.shape_cast %297 : vector<8x1xi1> to vector<8x1xi1>
    %299 = vector.broadcast %298 : vector<8x1xi1> to vector<8x32xi1>
    %300 = vector.broadcast %cst_72 : f32 to vector<8x32xf32>
    %301 = arith.select %299, %295, %300 : vector<8x32xi1>, vector<8x32xf32>
    %302 = arith.index_cast %c5_i32 : i32 to index
    %c0_73 = arith.constant 0 : index
    %c0_74 = arith.constant 0 : index
    %303 = vector.load %arg6[%302, %c0_73, %c0_74] : memref<8x8x32xf32, #tpu.memory_space<vmem>>, vector<1x8x32xf32>
    %304 = vector.shape_cast %303 : vector<1x8x32xf32> to vector<8x32xf32>
    %305 = vector.shape_cast %301 : vector<8x32xf32> to vector<1x8x32xf32>
    tpu.vector_store %arg6[%302, %c0_73, %c0_74], %305 {strides = array<i32>} : memref<8x8x32xf32, #tpu.memory_space<vmem>>, vector<1x8x32xf32>,
    %306 = vector.shape_cast %297 : vector<8x1xi1> to vector<8x1xi1>
    %307 = vector.broadcast %306 : vector<8x1xi1> to vector<8x32xi1>
    %308 = arith.select %307, %295, %258 : vector<8x32xi1>, vector<8x32xf32>
    %c1_i32_75 = arith.constant 1 : i32
    %309 = arith.addi %c5_i32, %c1_i32_75 : i32
    %310 = vector.broadcast %309 : i32 to vector<8x1xi32>
    %311 = arith.cmpi eq, %13, %310 : vector<8x1xi32>
    %312 = vector.shape_cast %311 : vector<8x1xi1> to vector<8x1xi1>
    %313 = vector.broadcast %312 : vector<8x1xi1> to vector<8x32xi1>
    %314 = arith.select %313, %295, %264 : vector<8x32xi1>, vector<8x32xf32>
    %c6_i32 = arith.constant 6 : i32
    %315 = arith.index_cast %c6_i32 : i32 to index
    %c0_76 = arith.constant 0 : index
    %c0_77 = arith.constant 0 : index
    %316 = vector.load %arg8[%315, %c0_76, %c0_77] : memref<8x8x96xf32, #tpu.memory_space<vmem>>, vector<1x8x96xf32>
    %317 = vector.shape_cast %316 : vector<1x8x96xf32> to vector<8x96xf32>
    %cst_78 = arith.constant dense<0.000000e+00> : vector<8x96xf32>
    %318 = tpu.matmul %308, %9, %cst_78 {dimension_numbers = #tpu.dot_dimension_numbers<[1], [0], [0], [1], [0, 0, 1, 1], [], []>} : vector<8x32xf32>, vector<32x96xf32>, vector<8x96xf32> -> vector<8x96xf32>
    %319 = arith.addf %318, %12 : vector<8x96xf32>
    %320 = vector.extract_strided_slice %317 {offsets = [0, 0], sizes = [8, 32], strides = [1, 1]} : vector<8x96xf32> to vector<8x32xf32>
    %321 = vector.extract_strided_slice %319 {offsets = [0, 0], sizes = [8, 32], strides = [1, 1]} : vector<8x96xf32> to vector<8x32xf32>
    %322 = arith.addf %320, %321 : vector<8x32xf32>
    %323 = arith.negf %322 : vector<8x32xf32>
    %324 = math.exp %323 : vector<8x32xf32>
    %cst_79 = arith.constant 1.000000e+00 : f32
    %325 = vector.broadcast %cst_79 : f32 to vector<8x32xf32>
    %326 = arith.addf %325, %324 : vector<8x32xf32>
    %327 = arith.divf %325, %326 : vector<8x32xf32>
    %328 = vector.extract_strided_slice %317 {offsets = [0, 32], sizes = [8, 32], strides = [1, 1]} : vector<8x96xf32> to vector<8x32xf32>
    %329 = vector.extract_strided_slice %319 {offsets = [0, 32], sizes = [8, 32], strides = [1, 1]} : vector<8x96xf32> to vector<8x32xf32>
    %330 = arith.addf %328, %329 : vector<8x32xf32>
    %331 = arith.negf %330 : vector<8x32xf32>
    %332 = math.exp %331 : vector<8x32xf32>
    %cst_80 = arith.constant 1.000000e+00 : f32
    %333 = vector.broadcast %cst_80 : f32 to vector<8x32xf32>
    %334 = arith.addf %333, %332 : vector<8x32xf32>
    %335 = arith.divf %333, %334 : vector<8x32xf32>
    %336 = vector.extract_strided_slice %317 {offsets = [0, 64], sizes = [8, 32], strides = [1, 1]} : vector<8x96xf32> to vector<8x32xf32>
    %337 = vector.extract_strided_slice %319 {offsets = [0, 64], sizes = [8, 32], strides = [1, 1]} : vector<8x96xf32> to vector<8x32xf32>
    %338 = arith.mulf %327, %337 : vector<8x32xf32>
    %339 = arith.addf %336, %338 : vector<8x32xf32>
    %340 = math.tanh %339 : vector<8x32xf32>
    %cst_81 = arith.constant 1.000000e+00 : f32
    %341 = vector.broadcast %cst_81 : f32 to vector<8x32xf32>
    %342 = arith.subf %341, %335 : vector<8x32xf32>
    %343 = arith.mulf %342, %340 : vector<8x32xf32>
    %344 = arith.mulf %335, %308 : vector<8x32xf32>
    %345 = arith.addf %343, %344 : vector<8x32xf32>
    %346 = vector.broadcast %c6_i32 : i32 to vector<8x1xi32>
    %347 = arith.cmpi sgt, %13, %346 : vector<8x1xi32>
    %cst_82 = arith.constant 0.000000e+00 : f32
    %348 = vector.shape_cast %347 : vector<8x1xi1> to vector<8x1xi1>
    %349 = vector.broadcast %348 : vector<8x1xi1> to vector<8x32xi1>
    %350 = vector.broadcast %cst_82 : f32 to vector<8x32xf32>
    %351 = arith.select %349, %345, %350 : vector<8x32xi1>, vector<8x32xf32>
    %352 = arith.index_cast %c6_i32 : i32 to index
    %c0_83 = arith.constant 0 : index
    %c0_84 = arith.constant 0 : index
    %353 = vector.load %arg6[%352, %c0_83, %c0_84] : memref<8x8x32xf32, #tpu.memory_space<vmem>>, vector<1x8x32xf32>
    %354 = vector.shape_cast %353 : vector<1x8x32xf32> to vector<8x32xf32>
    %355 = vector.shape_cast %351 : vector<8x32xf32> to vector<1x8x32xf32>
    tpu.vector_store %arg6[%352, %c0_83, %c0_84], %355 {strides = array<i32>} : memref<8x8x32xf32, #tpu.memory_space<vmem>>, vector<1x8x32xf32>,
    %356 = vector.shape_cast %347 : vector<8x1xi1> to vector<8x1xi1>
    %357 = vector.broadcast %356 : vector<8x1xi1> to vector<8x32xi1>
    %358 = arith.select %357, %345, %308 : vector<8x32xi1>, vector<8x32xf32>
    %c1_i32_85 = arith.constant 1 : i32
    %359 = arith.addi %c6_i32, %c1_i32_85 : i32
    %360 = vector.broadcast %359 : i32 to vector<8x1xi32>
    %361 = arith.cmpi eq, %13, %360 : vector<8x1xi32>
    %362 = vector.shape_cast %361 : vector<8x1xi1> to vector<8x1xi1>
    %363 = vector.broadcast %362 : vector<8x1xi1> to vector<8x32xi1>
    %364 = arith.select %363, %345, %314 : vector<8x32xi1>, vector<8x32xf32>
    %c7_i32 = arith.constant 7 : i32
    %365 = arith.index_cast %c7_i32 : i32 to index
    %c0_86 = arith.constant 0 : index
    %c0_87 = arith.constant 0 : index
    %366 = vector.load %arg8[%365, %c0_86, %c0_87] : memref<8x8x96xf32, #tpu.memory_space<vmem>>, vector<1x8x96xf32>
    %367 = vector.shape_cast %366 : vector<1x8x96xf32> to vector<8x96xf32>
    %cst_88 = arith.constant dense<0.000000e+00> : vector<8x96xf32>
    %368 = tpu.matmul %358, %9, %cst_88 {dimension_numbers = #tpu.dot_dimension_numbers<[1], [0], [0], [1], [0, 0, 1, 1], [], []>} : vector<8x32xf32>, vector<32x96xf32>, vector<8x96xf32> -> vector<8x96xf32>
    %369 = arith.addf %368, %12 : vector<8x96xf32>
    %370 = vector.extract_strided_slice %367 {offsets = [0, 0], sizes = [8, 32], strides = [1, 1]} : vector<8x96xf32> to vector<8x32xf32>
    %371 = vector.extract_strided_slice %369 {offsets = [0, 0], sizes = [8, 32], strides = [1, 1]} : vector<8x96xf32> to vector<8x32xf32>
    %372 = arith.addf %370, %371 : vector<8x32xf32>
    %373 = arith.negf %372 : vector<8x32xf32>
    %374 = math.exp %373 : vector<8x32xf32>
    %cst_89 = arith.constant 1.000000e+00 : f32
    %375 = vector.broadcast %cst_89 : f32 to vector<8x32xf32>
    %376 = arith.addf %375, %374 : vector<8x32xf32>
    %377 = arith.divf %375, %376 : vector<8x32xf32>
    %378 = vector.extract_strided_slice %367 {offsets = [0, 32], sizes = [8, 32], strides = [1, 1]} : vector<8x96xf32> to vector<8x32xf32>
    %379 = vector.extract_strided_slice %369 {offsets = [0, 32], sizes = [8, 32], strides = [1, 1]} : vector<8x96xf32> to vector<8x32xf32>
    %380 = arith.addf %378, %379 : vector<8x32xf32>
    %381 = arith.negf %380 : vector<8x32xf32>
    %382 = math.exp %381 : vector<8x32xf32>
    %cst_90 = arith.constant 1.000000e+00 : f32
    %383 = vector.broadcast %cst_90 : f32 to vector<8x32xf32>
    %384 = arith.addf %383, %382 : vector<8x32xf32>
    %385 = arith.divf %383, %384 : vector<8x32xf32>
    %386 = vector.extract_strided_slice %367 {offsets = [0, 64], sizes = [8, 32], strides = [1, 1]} : vector<8x96xf32> to vector<8x32xf32>
    %387 = vector.extract_strided_slice %369 {offsets = [0, 64], sizes = [8, 32], strides = [1, 1]} : vector<8x96xf32> to vector<8x32xf32>
    %388 = arith.mulf %377, %387 : vector<8x32xf32>
    %389 = arith.addf %386, %388 : vector<8x32xf32>
    %390 = math.tanh %389 : vector<8x32xf32>
    %cst_91 = arith.constant 1.000000e+00 : f32
    %391 = vector.broadcast %cst_91 : f32 to vector<8x32xf32>
    %392 = arith.subf %391, %385 : vector<8x32xf32>
    %393 = arith.mulf %392, %390 : vector<8x32xf32>
    %394 = arith.mulf %385, %358 : vector<8x32xf32>
    %395 = arith.addf %393, %394 : vector<8x32xf32>
    %396 = vector.broadcast %c7_i32 : i32 to vector<8x1xi32>
    %397 = arith.cmpi sgt, %13, %396 : vector<8x1xi32>
    %cst_92 = arith.constant 0.000000e+00 : f32
    %398 = vector.shape_cast %397 : vector<8x1xi1> to vector<8x1xi1>
    %399 = vector.broadcast %398 : vector<8x1xi1> to vector<8x32xi1>
    %400 = vector.broadcast %cst_92 : f32 to vector<8x32xf32>
    %401 = arith.select %399, %395, %400 : vector<8x32xi1>, vector<8x32xf32>
    %402 = arith.index_cast %c7_i32 : i32 to index
    %c0_93 = arith.constant 0 : index
    %c0_94 = arith.constant 0 : index
    %403 = vector.load %arg6[%402, %c0_93, %c0_94] : memref<8x8x32xf32, #tpu.memory_space<vmem>>, vector<1x8x32xf32>
    %404 = vector.shape_cast %403 : vector<1x8x32xf32> to vector<8x32xf32>
    %405 = vector.shape_cast %401 : vector<8x32xf32> to vector<1x8x32xf32>
    tpu.vector_store %arg6[%402, %c0_93, %c0_94], %405 {strides = array<i32>} : memref<8x8x32xf32, #tpu.memory_space<vmem>>, vector<1x8x32xf32>,
    %406 = vector.shape_cast %397 : vector<8x1xi1> to vector<8x1xi1>
    %407 = vector.broadcast %406 : vector<8x1xi1> to vector<8x32xi1>
    %408 = arith.select %407, %395, %358 : vector<8x32xi1>, vector<8x32xf32>
    %c1_i32_95 = arith.constant 1 : i32
    %409 = arith.addi %c7_i32, %c1_i32_95 : i32
    %410 = vector.broadcast %409 : i32 to vector<8x1xi32>
    %411 = arith.cmpi eq, %13, %410 : vector<8x1xi32>
    %412 = vector.shape_cast %411 : vector<8x1xi1> to vector<8x1xi1>
    %413 = vector.broadcast %412 : vector<8x1xi1> to vector<8x32xi1>
    %414 = arith.select %413, %395, %364 : vector<8x32xi1>, vector<8x32xf32>
    %c8_i32 = arith.constant 8 : i32
    %c0_96 = arith.constant 0 : index
    %c0_97 = arith.constant 0 : index
    %415 = vector.load %arg7[%c0_96, %c0_97] : memref<8x32xf32, #tpu.memory_space<vmem>>, vector<8x32xf32>
    tpu.vector_store %arg7[%c0_96, %c0_97], %414 {strides = array<i32>} : memref<8x32xf32, #tpu.memory_space<vmem>>, vector<8x32xf32>,
    return
  }
}

</mosaic_0001>

<bundles_post_ra>
// kernel: question_embedding_forward.1
= control target key start
LH: loop header
LB: loop body
LE: loop exit
PB: predicated region body
PF: predicated region fallthrough
CT: control target
= control target key end

     0   :  { %v1495_v0 = vmov 0.0|0.0   ;;  %vm1496_vm0 = vmmov 0   ;;  %v1497_v4 = vmov 0.0   ;;  %vm44_vm1 = vcmask 261120   ;;  %s1885_s2 = inlined_call_operand.vmem [shape: f32[32,96], index: 2, kind: input, shape index: {}]   ;;  %s1886_s3 = inlined_call_operand.vmem [shape: f32[32,96], index: 3, kind: input, shape index: {}]   ;;  %s1887_s0 = inlined_call_operand.vmem [shape: f32[8,8,32], index: 0, kind: input, shape index: {}]   ;;  %s1888_s1 = inlined_call_operand.vmem [shape: s32[8,1], index: 1, kind: input, shape index: {}]   ;;  %s1889_s5 = inlined_call_operand.vmem [shape: f32[1,96], index: 5, kind: input, shape index: {}]   ;;  %s1890_s4 = inlined_call_operand.vmem [shape: f32[1,96], index: 4, kind: input, shape index: {}]   ;;  %s1891_s6 = inlined_call_operand.vmem [shape: f32[8,8,32], index: 6, kind: output, shape index: {0}]   ;;  %s1892_s7 = inlined_call_operand.vmem [shape: f32[8,32], index: 7, kind: output, shape index: {1}]  }
   0x1   :  { %1391 = vmatprep.subr.bf16.mxu1 %v1495_v0  ;;  %v33_v1 = vld [vmem:[%s1885_s2] sm:$0xff]  ;;  %v34_v2 = vld [vmem:[%s1885_s2 + $0x8] sm:$0xff]  ;;  %1303 = vmatprep.mubr.msk.f32.mxu1 %vm1496_vm0, %v1497_v4  ;;  %v35_v7 = vld [vmem:[%s1885_s2 + $0x10] sm:$0xff]  ;;  %v1498_v16 = vmov 0   ;;  %vm174_vm3 = vcmask 785408  }
   0x2   :  { %v183_v3 = vld [vmem:[%s1886_s3] sm:$0xff]  ;;  %v1383_v5 = vpack.c.bf16 %v34_v2, %v33_v1  ;;  %v184_v6 = vld [vmem:[%s1886_s3 + $0x8] sm:$0xff]  ;;  %v36_v8 = vld [vmem:[%s1885_s2 + $0x18] sm:$0xff]  ;;  %1445 = vset.pattern.permute.xlu1 %v1498_v16  ;;  %1446 = vset.pattern.permute.xlu0 %v1498_v16 }
   0x3   :  { %v1562_v9 = vpack.c.bf16 %v184_v6, %v183_v3  ;;  %v1387_v10 = vpack.c.bf16 %v36_v8, %v35_v7  ;;  %v185_v11 = vld [vmem:[%s1886_s3 + $0x10] sm:$0xff]  ;;  %v186_v12 = vld [vmem:[%s1886_s3 + $0x18] sm:$0xff]  ;;  %v25_v13 = vld [vmem:[%s1887_s0] sm:$0xff] }
   0x4   :  { %1384 = vmatprep.subr.bf16.mxu0 %v1383_v5  ;;  %1283 = vmatprep.mubr.msk.f32.mxu0 %vm44_vm1, %v25_v13  ;;  %v1575_v14 = vpack.c.bf16 %v186_v12, %v185_v11  ;;  %v26_v15 = vld [vmem:[%s1887_s0 + $0x8] sm:$0xff]  ;;  %v1600_v17 = vld [vmem:[%s1888_s1] sm:$0xff]  ;;  %s1499_s1 = smov 64   ;;  %v27_v61 = vld [vmem:[%s1887_s0 + $0x10] sm:$0xff] }
   0x5   :  { %1393 = vmatpush3.bf16.msra.mxu1 %v1562_v9  ;;  %1386 = vmatpush3.bf16.msra.mxu0 %v1383_v5  ;;  %vm295_vm2 = vcmp.gt.s32.totalorder %v1600_v17, 0  ;;  %v1608_v19 = vld [vmem:[%s1889_s5] ss:$0 sm:$0xff]  ;;  %vm414_vm5 = vcmp.gt.s32.totalorder %v1600_v17, 1  ;;  %v28_v62 = vld [vmem:[%s1887_s0 + $0x18] sm:$0xff]  ;;  %v30_v1 = vld [vmem:[%s1887_s0 + $0x28] sm:$0xff] }
   0x6   :  { %1394 = vmatprep.subr.bf16.mxu1 %v1495_v0  ;;  %1388 = vmatprep.subr.bf16.mxu0 %v1387_v10  ;;  %v296_v18 = vsel %vm295_vm2, 1, %v1498_v16  ;;  %v1613_v20 = vld [vmem:[%s1890_s4] ss:$0 sm:$0xff]  ;;  %s1500_s4 = smov 96   ;;  %v415_v50 = vsel %vm414_vm5, 1, %v1498_v16  ;;  %v31_v2 = vld [vmem:[%s1887_s0 + $0x30] sm:$0xff] }
   0x7   :  { %298 = vperm.xlu1 %1445, %v296_v18   ;;  %v29_v63 = vld [vmem:[%s1887_s0 + $0x20] sm:$0xff]  ;;  %v32_v5 = vld [vmem:[%s1887_s0 + $0x38] sm:$0xff]  ;;  %vm538_vm7 = vcmp.gt.s32.totalorder %v1600_v17, 2  ;;  %vm662_vm9 = vcmp.gt.s32.totalorder %v1600_v17, 3  ;;  %vm786_vm11 = vcmp.gt.s32.totalorder %v1600_v17, 4  ;;  %vm910_vm13 = vcmp.gt.s32.totalorder %v1600_v17, 5 }
   0x8   :  { %vm1034_vm15 = vcmp.gt.s32.totalorder %v1600_v17, 6  ;;  %vm307_vm2 = vcmp.eq.s32.totalorder %v1600_v17, 1  ;;  %vm1048_vm5 = vcmp.eq.s32.totalorder %v1600_v17, 7 }
   0x9   :  { %1396 = vmatpush3.bf16.msra.mxu1 %v1575_v14  ;;  %1390 = vmatpush3.bf16.msra.mxu0 %v1387_v10 }
   0xa   :  { %1397 = vmatprep.subr.bf16.mxu1 %v1495_v0  ;;  %1403 = vmatprep.subr.bf16.mxu0 %v1495_v0 }
   0xc   :  { %1304 = vmatmul.mubr.f32.vlgmr.msra.gmra.mrb[0].mxu1 %v1497_v4  ;;  %1284 = vmatmul.mubr.msk.f32.vlgmr.msra.gmra.mrb[0].mxu0 %vm44_vm1, %v26_v15 }
   0xd   :  { %1399 = vmatpush3.bf16.msra.mxu1 %v1562_v9  ;;  %1314 = vmatprep.mubr.msk.f32.mxu1 %vm1496_vm0, %v1497_v4 }
   0xe   :  { %1400 = vmatprep.subr.bf16.mxu1 %v1495_v0  ;;  %1405 = vmatpush3.bf16.msra.mxu0 %v1562_v9 }
   0xf   :  { %1406 = vmatprep.subr.bf16.mxu0 %v1495_v0  ;;  %1286 = vmatprep.mubr.msk.f32.mxu0 %vm44_vm1, %v27_v61 }
  0x10   :  { %1287 = vmatmul.mubr.msk.f32.gmra.mrb[2].mxu0 %vm44_vm1, %v28_v62 }
  0x11   :  { %1402 = vmatpush3.bf16.msra.mxu1 %v1575_v14  ;;  %1289 = vmatprep.mubr.msk.f32.mxu0 %vm44_vm1, %v29_v63 }
  0x12   :  { %1408 = vmatpush3.bf16.msra.mxu0 %v1575_v14  ;;  %1409 = vmatprep.subr.bf16.mxu1 %v1495_v0 }
  0x13   :  { %1415 = vmatprep.subr.bf16.mxu0 %v1495_v0 }
  0x14   :  { %1290 = vmatmul.mubr.msk.f32.gmra.mrb[4].mxu0 %vm44_vm1, %v30_v1 }
  0x15   :  { %1292 = vmatprep.mubr.msk.f32.mxu0 %vm44_vm1, %v31_v2 }
  0x18   :  { %1293 = vmatmul.mubr.msk.f32.gmra.mrb[6].mxu0 %vm44_vm1, %v32_v5 }
  0x19   :  { %1325 = vmatprep.mubr.msk.f32.mxu0 %vm1496_vm0, %v1497_v4 }
  0x86   :  { %v299_v39 = vpop.permute.xlu1 %298 }
  0x87   :  { %vm300_vm4 = vcmp.eq.s32.totalorder %v299_v39, 1  ;;  %v539_v39 = vsel %vm538_vm7, 1, %v1498_v16  ;;  %vm1171_vm7 = vcmp.eq.s32.totalorder %v1600_v17, 8 }
  0xdf   :  { %v265_v21 = vpop.f32.mrb[0].mxu1  ;;  %v1285_v22 = vpop.f32.mrb[0].mxu0 }
  0xe0   :  { %v266_v23 = vadd.f32 %v1608_v19, %v265_v21  ;;  %v141_v24 = vadd.f32 %v1285_v22, %v1613_v20  ;;  %v1305_v25 = vpop.f32.mrb[1].mxu1  ;;  %v135_v26 = vpop.f32.mrb[1].mxu0 }
  0xe1   :  { %v136_v27 = vadd.f32 %v1613_v20, %v135_v26 }
  0xe2   :  { %176 = vst.msk [vmem:[#allocation2 + $0x8] sm:$0xff] %vm174_vm3, %v141_v24  ;;  %277 = vrot.lane.b32.xlu0 %v266_v23, %s1499_s1 }
  0xe3   :  { %175 = vst.msk [vmem:[#allocation2] sm:$0xff] %vm174_vm3, %v136_v27  ;;  %v1288_v15 = vpop.f32.mrb[2].mxu0 }
  0xe4   :  { %v151_v18 = vadd.f32 %v1288_v15, %v1613_v20  ;;  %v145_v21 = vpop.f32.mrb[3].mxu0 }
  0xe5   :  { %v146_v22 = vadd.f32 %v1613_v20, %v145_v21 }
  0xe6   :  { %178 = vst.msk [vmem:[#allocation2 + $0x18] sm:$0xff] %vm174_vm3, %v151_v18 }
  0xe7   :  { %177 = vst.msk [vmem:[#allocation2 + $0x10] sm:$0xff] %vm174_vm3, %v146_v22 }
  0xe9   :  { %v315_v51 = vld [vmem:[#allocation2 + $0x8] sm:$0xff] }
  0xea   :  { %v195_v28 = vld [vmem:[#allocation2] sm:$0xff] }
  0xeb   :  { %v269_v29 = vadd.f32 %v266_v23, %v195_v28  ;;  %v1291_v23 = vpop.f32.mrb[4].mxu0 }
  0xec   :  { %v161_v24 = vadd.f32 %v1291_v23, %v1613_v20  ;;  %v155_v25 = vpop.f32.mrb[5].mxu0 }
  0xed   :  { %v1201_v30 = vmul.f32 -1.442695, %v269_v29  ;;  %v156_v26 = vadd.f32 %v1613_v20, %v155_v25  ;;  %v1294_v27 = vpop.f32.mrb[6].mxu0 }
  0xee   :  { %180 = vst.msk [vmem:[#allocation2 + $0x28] sm:$0xff] %vm174_vm3, %v161_v24  ;;  %v165_v29 = vpop.f32.mrb[7].mxu0 }
  0xef   :  { %1447 = vpow2.f32 %v1201_v30  ;;  %179 = vst.msk [vmem:[#allocation2 + $0x20] sm:$0xff] %vm174_vm3, %v156_v26  ;;  %v166_v30 = vadd.f32 %v1613_v20, %v165_v29 }
  0xf1   :  { %181 = vst.msk [vmem:[#allocation2 + $0x30] sm:$0xff] %vm174_vm3, %v166_v30 }
  0xf9   :  { %v1448_v31 = vpop.eup %1447 }
  0xfa   :  { %v273_v32 = vadd.f32 1.0, %v1448_v31 }
  0xfc   :  { %1449 = vrcp.f32 %v273_v32 }
 0x106   :  { %v1450_v33 = vpop.eup %1449 }
 0x107   :  { %v287_v40 = vsub.f32 1.0, %v1450_v33  ;;  %v293_v42 = vmul.f32 0.0, %v1450_v33 }
 0x154   :  { %v278_v34 = vpop.permute.xlu0 %277 }
 0x155   :  { %v280_v35 = vmul.f32 %v1450_v33, %v278_v34  ;;  %v436_v34 = vld [vmem:[#allocation2 + $0x10] sm:$0xff] }
 0x157   :  { %282 = vrot.lane.b32.xlu0 %v280_v35, %s1499_s1 }
 0x1c9   :  { %v283_v36 = vpop.permute.xlu0 %282 }
 0x1ca   :  { %v285_v37 = vadd.f32 %v283_v36, %v195_v28  ;;  %v171_v28 = vadd.f32 %v1294_v27, %v1613_v20  ;;  %v787_v27 = vsel %vm786_vm11, 1, %v1498_v16  ;;  %vm1158_vm11 = vcmp.gt.s32.totalorder %v1600_v17, 7 }
 0x1cc   :  { %1451 = vtanh.f32 %v285_v37  ;;  %182 = vst.msk [vmem:[#allocation2 + $0x38] sm:$0xff] %vm174_vm3, %v171_v28  ;;  %v684_v28 = vld [vmem:[#allocation2 + $0x20] sm:$0xff]  ;;  %vm552_vm3 = vcmp.eq.s32.totalorder %v1600_v17, 3 }
 0x1d6   :  { %v1452_v38 = vpop.eup %1451 }
 0x1d7   :  { %289 = vrot.lane.b32.xlu1 %v1452_v38, %s1500_s4 }
 0x249   :  { %v290_v41 = vpop.permute.xlu1 %289 }
 0x24a   :  { %v292_v43 = vmul.f32 %v290_v41, %v287_v40 }
 0x24c   :  { %v1623_v44 = vadd.f32 %v293_v42, %v292_v43 }
 0x24e   :  { %v301_v45 = vsel %vm300_vm4, %v1623_v44, 0.0  ;;  %vm800_vm4 = vcmp.eq.s32.totalorder %v1600_v17, 5 }
 0x24f   :  { %303 = vrot.lane.b32.xlu0 %v301_v45, %s1500_s4 }
 0x2c1   :  { %v304_v46 = vpop.permute.xlu0 %303 }
 0x2c2   :  { %306 = vst.msk [vmem:[%s1891_s6] sm:$0xff] %vm44_vm1, %v304_v46  ;;  %1315 = vmatmul.mubr.msk.f32.vlgmr.msra.gmra.mrb[2].mxu1 %vm44_vm1, %v304_v46 }
 0x2c3   :  { %1411 = vmatpush3.bf16.msra.mxu1 %v1562_v9  ;;  %1336 = vmatprep.mubr.msk.f32.mxu1 %vm1496_vm0, %v1497_v4 }
 0x2c4   :  { %1412 = vmatprep.subr.bf16.mxu1 %v1495_v0 }
 0x2c7   :  { %1414 = vmatpush3.bf16.msra.mxu1 %v1575_v14 }
 0x2c8   :  { %1421 = vmatprep.subr.bf16.mxu1 %v1495_v0 }
 0x395   :  { %v384_v47 = vpop.f32.mrb[2].mxu1 }
 0x396   :  { %v385_v48 = vadd.f32 %v1608_v19, %v384_v47  ;;  %v1316_v49 = vpop.f32.mrb[3].mxu1 }
 0x398   :  { %396 = vrot.lane.b32.xlu1 %v385_v48, %s1499_s1  ;;  %v388_v52 = vadd.f32 %v385_v48, %v315_v51 }
 0x39a   :  { %v1203_v53 = vmul.f32 -1.442695, %v388_v52 }
 0x39c   :  { %417 = vperm.xlu1 %1445, %v415_v50   ;;  %1453 = vpow2.f32 %v1203_v53 }
 0x3a6   :  { %v1454_v54 = vpop.eup %1453 }
 0x3a7   :  { %v392_v55 = vadd.f32 1.0, %v1454_v54 }
 0x3a9   :  { %1455 = vrcp.f32 %v392_v55 }
 0x3b3   :  { %v1456_v56 = vpop.eup %1455 }
 0x3b4   :  { %v406_v6 = vsub.f32 1.0, %v1456_v56  ;;  %v412_v10 = vmul.f32 %v1456_v56, %v301_v45 }
 0x40a   :  { %v397_v57 = vpop.permute.xlu1 %396 }
 0x40b   :  { %v399_v58 = vmul.f32 %v1456_v56, %v397_v57 }
 0x40d   :  { %401 = vrot.lane.b32.xlu0 %v399_v58, %s1499_s1  ;;  %v663_v58 = vsel %vm662_vm9, 1, %v1498_v16  ;;  %vm676_vm9 = vcmp.eq.s32.totalorder %v1600_v17, 4 }
 0x41b   :  { %v1670_v8 = vpop.permute.xlu1 %417 }
 0x41c   :  { %vm419_vm6 = vcmp.eq.s32.totalorder %v1670_v8, 1 }
 0x47f   :  { %v402_v59 = vpop.permute.xlu0 %401 }
 0x480   :  { %v404_v60 = vadd.f32 %v402_v59, %v315_v51  ;;  %v560_v59 = vld [vmem:[#allocation2 + $0x18] sm:$0xff] }
 0x482   :  { %1457 = vtanh.f32 %v404_v60 }
 0x48c   :  { %v1458_v3 = vpop.eup %1457 }
 0x48d   :  { %408 = vrot.lane.b32.xlu0 %v1458_v3, %s1500_s4 }
 0x4ff   :  { %v409_v7 = vpop.permute.xlu0 %408 }
 0x500   :  { %v411_v11 = vmul.f32 %v409_v7, %v406_v6 }
 0x502   :  { %v1672_v12 = vadd.f32 %v412_v10, %v411_v11 }
 0x504   :  { %v427_v13 = vsel %vm419_vm6, %v1672_v12, %v301_v45 }
 0x505   :  { %438 = vrot.lane.b32.xlu1 %v427_v13, %s1500_s4 }
 0x577   :  { %v439_v31 = vpop.permute.xlu1 %438 }
 0x578   :  { %1326 = vmatmul.mubr.msk.f32.vlgmr.msra.gmra.mrb[8].mxu0 %vm44_vm1, %v439_v31 }
 0x579   :  { %1417 = vmatpush3.bf16.msra.mxu0 %v1562_v9  ;;  %1347 = vmatprep.mubr.msk.f32.mxu0 %vm1496_vm0, %v1497_v4 }
 0x57a   :  { %1418 = vmatprep.subr.bf16.mxu0 %v1495_v0 }
 0x57d   :  { %1420 = vmatpush3.bf16.msra.mxu0 %v1575_v14 }
 0x57e   :  { %1427 = vmatprep.subr.bf16.mxu0 %v1495_v0 }
 0x64b   :  { %v508_v32 = vpop.f32.mrb[8].mxu0 }
 0x64c   :  { %v509_v20 = vadd.f32 %v1608_v19, %v508_v32  ;;  %v1327_v33 = vpop.f32.mrb[9].mxu0 }
 0x64e   :  { %520 = vrot.lane.b32.xlu0 %v509_v20, %s1499_s1  ;;  %v512_v35 = vadd.f32 %v509_v20, %v436_v34 }
 0x650   :  { %v1206_v36 = vmul.f32 -1.442695, %v512_v35 }
 0x652   :  { %1459 = vpow2.f32 %v1206_v36  ;;  %541 = vperm.xlu0 %1446, %v539_v39  }
 0x65c   :  { %v1460_v37 = vpop.eup %1459 }
 0x65d   :  { %v516_v38 = vadd.f32 1.0, %v1460_v37 }
 0x65f   :  { %1461 = vrcp.f32 %v516_v38 }
 0x669   :  { %v1462_v40 = vpop.eup %1461 }
 0x66a   :  { %v530_v47 = vsub.f32 1.0, %v1462_v40  ;;  %v536_v50 = vmul.f32 %v1462_v40, %v427_v13 }
 0x6c0   :  { %v521_v41 = vpop.permute.xlu0 %520 }
 0x6c1   :  { %v523_v42 = vmul.f32 %v1462_v40, %v521_v41 }
 0x6c3   :  { %525 = vrot.lane.b32.xlu1 %v523_v42, %s1499_s1 }
 0x6d1   :  { %v1704_v48 = vpop.permute.xlu0 %541 }
 0x6d2   :  { %vm543_vm8 = vcmp.eq.s32.totalorder %v1704_v48, 1 }
 0x735   :  { %v526_v43 = vpop.permute.xlu1 %525 }
 0x736   :  { %v528_v45 = vadd.f32 %v526_v43, %v436_v34 }
 0x738   :  { %1463 = vtanh.f32 %v528_v45 }
 0x742   :  { %v1464_v46 = vpop.eup %1463 }
 0x743   :  { %532 = vrot.lane.b32.xlu1 %v1464_v46, %s1500_s4 }
 0x7b5   :  { %v533_v49 = vpop.permute.xlu1 %532 }
 0x7b6   :  { %v535_v51 = vmul.f32 %v533_v49, %v530_v47 }
 0x7b8   :  { %v1707_v52 = vadd.f32 %v536_v50, %v535_v51  ;;  %v911_v51 = vsel %vm910_vm13, 1, %v1498_v16 }
 0x7ba   :  { %v551_v53 = vsel %vm543_vm8, %v1707_v52, %v427_v13 }
 0x7bb   :  { %562 = vrot.lane.b32.xlu1 %v551_v53, %s1500_s4 }
 0x82d   :  { %v563_v54 = vpop.permute.xlu1 %562 }
 0x82e   :  { %1337 = vmatmul.mubr.msk.f32.vlgmr.msra.gmra.mrb[4].mxu1 %vm44_vm1, %v563_v54 }
 0x82f   :  { %1423 = vmatpush3.bf16.msra.mxu1 %v1562_v9  ;;  %1358 = vmatprep.mubr.msk.f32.mxu1 %vm1496_vm0, %v1497_v4 }
 0x830   :  { %1424 = vmatprep.subr.bf16.mxu1 %v1495_v0 }
 0x833   :  { %1426 = vmatpush3.bf16.msra.mxu1 %v1575_v14 }
 0x834   :  { %1433 = vmatprep.subr.bf16.mxu1 %v1495_v0 }
 0x901   :  { %v632_v55 = vpop.f32.mrb[4].mxu1 }
 0x902   :  { %v633_v56 = vadd.f32 %v1608_v19, %v632_v55  ;;  %v1338_v57 = vpop.f32.mrb[5].mxu1 }
 0x904   :  { %644 = vrot.lane.b32.xlu0 %v633_v56, %s1499_s1  ;;  %v636_v60 = vadd.f32 %v633_v56, %v560_v59 }
 0x906   :  { %v1209_v61 = vmul.f32 -1.442695, %v636_v60 }
 0x908   :  { %665 = vperm.xlu0 %1446, %v663_v58   ;;  %1465 = vpow2.f32 %v1209_v61 }
 0x912   :  { %v1466_v62 = vpop.eup %1465 }
 0x913   :  { %v640_v63 = vadd.f32 1.0, %v1466_v62 }
 0x915   :  { %1467 = vrcp.f32 %v640_v63 }
 0x91f   :  { %v1468_v1 = vpop.eup %1467 }
 0x920   :  { %v654_v10 = vsub.f32 1.0, %v1468_v1  ;;  %v660_v15 = vmul.f32 %v1468_v1, %v551_v53 }
 0x976   :  { %v645_v2 = vpop.permute.xlu0 %644 }
 0x977   :  { %v647_v3 = vmul.f32 %v1468_v1, %v645_v2 }
 0x979   :  { %649 = vrot.lane.b32.xlu1 %v647_v3, %s1499_s1 }
 0x987   :  { %v1726_v13 = vpop.permute.xlu0 %665 }
 0x988   :  { %vm667_vm10 = vcmp.eq.s32.totalorder %v1726_v13, 1 }
 0x9eb   :  { %v650_v5 = vpop.permute.xlu1 %649 }
 0x9ec   :  { %v652_v6 = vadd.f32 %v650_v5, %v560_v59 }
 0x9ee   :  { %1469 = vtanh.f32 %v652_v6 }
 0x9f8   :  { %v1470_v7 = vpop.eup %1469 }
 0x9f9   :  { %656 = vrot.lane.b32.xlu1 %v1470_v7, %s1500_s4 }
 0xa6b   :  { %v657_v11 = vpop.permute.xlu1 %656 }
 0xa6c   :  { %v659_v18 = vmul.f32 %v657_v11, %v654_v10  ;;  %v1035_v11 = vsel %vm1034_vm15, 1, %v1498_v16 }
 0xa6e   :  { %v1728_v21 = vadd.f32 %v660_v15, %v659_v18  ;;  %v932_v15 = vld [vmem:[#allocation2 + $0x30] sm:$0xff] }
 0xa70   :  { %v675_v22 = vsel %vm667_vm10, %v1728_v21, %v551_v53  ;;  %v808_v53 = vld [vmem:[#allocation2 + $0x28] sm:$0xff] }
 0xa71   :  { %686 = vrot.lane.b32.xlu0 %v675_v22, %s1500_s4 }
 0xae3   :  { %v687_v23 = vpop.permute.xlu0 %686 }
 0xae4   :  { %1348 = vmatmul.mubr.msk.f32.vlgmr.msra.gmra.mrb[10].mxu0 %vm44_vm1, %v687_v23 }
 0xae5   :  { %1429 = vmatpush3.bf16.msra.mxu0 %v1562_v9  ;;  %1369 = vmatprep.mubr.msk.f32.mxu0 %vm1496_vm0, %v1497_v4 }
 0xae6   :  { %1430 = vmatprep.subr.bf16.mxu0 %v1495_v0 }
 0xae9   :  { %1432 = vmatpush3.bf16.msra.mxu0 %v1575_v14 }
 0xbb7   :  { %v756_v24 = vpop.f32.mrb[10].mxu0 }
 0xbb8   :  { %v757_v25 = vadd.f32 %v1608_v19, %v756_v24  ;;  %v1349_v26 = vpop.f32.mrb[11].mxu0 }
 0xbba   :  { %768 = vrot.lane.b32.xlu1 %v757_v25, %s1499_s1  ;;  %v760_v29 = vadd.f32 %v757_v25, %v684_v28 }
 0xbbc   :  { %v1212_v30 = vmul.f32 -1.442695, %v760_v29 }
 0xbbe   :  { %789 = vperm.xlu1 %1445, %v787_v27   ;;  %1471 = vpow2.f32 %v1212_v30 }
 0xbc8   :  { %v1472_v31 = vpop.eup %1471 }
 0xbc9   :  { %v764_v32 = vadd.f32 1.0, %v1472_v31 }
 0xbcb   :  { %1473 = vrcp.f32 %v764_v32 }
 0xbd5   :  { %v1474_v20 = vpop.eup %1473 }
 0xbd6   :  { %v778_v38 = vsub.f32 1.0, %v1474_v20  ;;  %v784_v41 = vmul.f32 %v1474_v20, %v675_v22 }
 0xc2c   :  { %v769_v33 = vpop.permute.xlu1 %768 }
 0xc2d   :  { %v771_v34 = vmul.f32 %v1474_v20, %v769_v33 }
 0xc2f   :  { %773 = vrot.lane.b32.xlu0 %v771_v34, %s1499_s1 }
 0xc3d   :  { %v1747_v40 = vpop.permute.xlu1 %789 }
 0xc3e   :  { %vm791_vm12 = vcmp.eq.s32.totalorder %v1747_v40, 1 }
 0xca1   :  { %v774_v35 = vpop.permute.xlu0 %773 }
 0xca2   :  { %v776_v36 = vadd.f32 %v774_v35, %v684_v28 }
 0xca4   :  { %1475 = vtanh.f32 %v776_v36 }
 0xcae   :  { %v1476_v37 = vpop.eup %1475 }
 0xcaf   :  { %780 = vrot.lane.b32.xlu0 %v1476_v37, %s1500_s4 }
 0xd21   :  { %v781_v39 = vpop.permute.xlu0 %780 }
 0xd22   :  { %v783_v42 = vmul.f32 %v781_v39, %v778_v38 }
 0xd24   :  { %v1749_v43 = vadd.f32 %v784_v41, %v783_v42  ;;  %v308_v42 = vsel %vm307_vm2, 1, %v1498_v16 }
 0xd26   :  { %v799_v45 = vsel %vm791_vm12, %v1749_v43, %v675_v22 }
 0xd27   :  { %810 = vrot.lane.b32.xlu1 %v799_v45, %s1500_s4 }
 0xd99   :  { %v811_v46 = vpop.permute.xlu1 %810 }
 0xd9a   :  { %1359 = vmatmul.mubr.msk.f32.vlgmr.msra.gmra.mrb[6].mxu1 %vm44_vm1, %v811_v46  ;;  %v801_v46 = vsel %vm800_vm4, 1, %v1498_v16 }
 0xd9b   :  { %1435 = vmatpush3.bf16.msra.mxu1 %v1562_v9  ;;  %1380 = vmatprep.mubr.msk.f32.mxu1 %vm1496_vm0, %v1497_v4 }
 0xd9c   :  { %1436 = vmatprep.subr.bf16.mxu1 %v1495_v0 }
 0xd9f   :  { %1438 = vmatpush3.bf16.msra.mxu1 %v1575_v14 }
 0xe6d   :  { %v880_v47 = vpop.f32.mrb[6].mxu1 }
 0xe6e   :  { %v881_v49 = vadd.f32 %v1608_v19, %v880_v47  ;;  %v1360_v50 = vpop.f32.mrb[7].mxu1  ;;  %v1172_v47 = vsel %vm1171_vm7, 1, %v1498_v16 }
 0xe6f   :  { %v668_v50 = vsel %vm667_vm10, %v1728_v21, 0.0  ;;  %vm924_vm10 = vcmp.eq.s32.totalorder %v1600_v17, 6 }
 0xe70   :  { %892 = vrot.lane.b32.xlu0 %v881_v49, %s1499_s1  ;;  %v884_v9 = vadd.f32 %v881_v49, %v808_v53  ;;  %v420_v49 = vsel %vm419_vm6, %v1672_v12, 0.0  ;;  %vm428_vm6 = vcmp.eq.s32.totalorder %v1600_v17, 2 }
 0xe71   :  { %v429_v13 = vsel %vm428_vm6, 1, %v1498_v16 }
 0xe72   :  { %v1215_v54 = vmul.f32 -1.442695, %v884_v9 }
 0xe74   :  { %913 = vperm.xlu0 %1446, %v911_v51   ;;  %1477 = vpow2.f32 %v1215_v54 }
 0xe7e   :  { %v1478_v4 = vpop.eup %1477 }
 0xe7f   :  { %v888_v55 = vadd.f32 1.0, %v1478_v4 }
 0xe81   :  { %1479 = vrcp.f32 %v888_v55 }
 0xe8b   :  { %v1480_v0 = vpop.eup %1479 }
 0xe8c   :  { %v902_v60 = vsub.f32 1.0, %v1480_v0  ;;  %v908_v63 = vmul.f32 %v1480_v0, %v799_v45 }
 0xee2   :  { %v893_v14 = vpop.permute.xlu0 %892 }
 0xee3   :  { %v895_v56 = vmul.f32 %v1480_v0, %v893_v14 }
 0xee5   :  { %897 = vrot.lane.b32.xlu1 %v895_v56, %s1499_s1  ;;  %v677_v56 = vsel %vm676_vm9, 1, %v1498_v16 }
 0xef3   :  { %v1768_v62 = vpop.permute.xlu0 %913 }
 0xef4   :  { %vm915_vm14 = vcmp.eq.s32.totalorder %v1768_v62, 1 }
 0xf57   :  { %v898_v57 = vpop.permute.xlu1 %897 }
 0xf58   :  { %v900_v58 = vadd.f32 %v898_v57, %v808_v53  ;;  %v1056_v53 = vld [vmem:[#allocation2 + $0x38] sm:$0xff]  ;;  %v925_v57 = vsel %vm924_vm10, 1, %v1498_v16 }
 0xf5a   :  { %1481 = vtanh.f32 %v900_v58  ;;  %v1159_v58 = vsel %vm1158_vm11, 1, %v1498_v16 }
 0xf64   :  { %v1482_v59 = vpop.eup %1481 }
 0xf65   :  { %904 = vrot.lane.b32.xlu1 %v1482_v59, %s1500_s4 }
 0xfd7   :  { %v905_v61 = vpop.permute.xlu1 %904 }
 0xfd8   :  { %v907_v1 = vmul.f32 %v905_v61, %v902_v60 }
 0xfda   :  { %v1770_v2 = vadd.f32 %v908_v63, %v907_v1 }
 0xfdc   :  { %v923_v3 = vsel %vm915_vm14, %v1770_v2, %v799_v45  ;;  %v553_v45 = vsel %vm552_vm3, 1, %v1498_v16  ;;  %v916_v51 = vsel %vm915_vm14, %v1770_v2, 0.0 }
 0xfdd   :  { %934 = vrot.lane.b32.xlu0 %v923_v3, %s1500_s4 }
0x104f   :  { %v935_v5 = vpop.permute.xlu0 %934 }
0x1050   :  { %1370 = vmatmul.mubr.msk.f32.vlgmr.msra.gmra.mrb[12].mxu0 %vm44_vm1, %v935_v5 }
0x1123   :  { %v1004_v6 = vpop.f32.mrb[12].mxu0 }
0x1124   :  { %v1005_v7 = vadd.f32 %v1608_v19, %v1004_v6  ;;  %v1371_v10 = vpop.f32.mrb[13].mxu0 }
0x1126   :  { %1016 = vrot.lane.b32.xlu1 %v1005_v7, %s1499_s1  ;;  %v1008_v18 = vadd.f32 %v1005_v7, %v932_v15  ;;  %v544_v7 = vsel %vm543_vm8, %v1707_v52, 0.0 }
0x1128   :  { %v1218_v22 = vmul.f32 -1.442695, %v1008_v18 }
0x112a   :  { %1037 = vperm.xlu1 %1445, %v1035_v11   ;;  %1483 = vpow2.f32 %v1218_v22 }
0x1134   :  { %v1484_v23 = vpop.eup %1483 }
0x1135   :  { %v1012_v24 = vadd.f32 1.0, %v1484_v23  ;;  %v792_v23 = vsel %vm791_vm12, %v1749_v43, 0.0 }
0x1137   :  { %1485 = vrcp.f32 %v1012_v24 }
0x1141   :  { %v1486_v25 = vpop.eup %1485 }
0x1142   :  { %v1026_v31 = vsub.f32 1.0, %v1486_v25  ;;  %v1032_v33 = vmul.f32 %v1486_v25, %v923_v3 }
0x1198   :  { %v1017_v26 = vpop.permute.xlu1 %1016 }
0x1199   :  { %v1019_v27 = vmul.f32 %v1486_v25, %v1017_v26 }
0x119b   :  { %1021 = vrot.lane.b32.xlu0 %v1019_v27, %s1499_s1 }
0x11a9   :  { %v1784_v20 = vpop.permute.xlu1 %1037 }
0x11aa   :  { %vm1039_vm0 = vcmp.eq.s32.totalorder %v1784_v20, 1 }
0x120d   :  { %v1022_v28 = vpop.permute.xlu0 %1021 }
0x120e   :  { %v1024_v29 = vadd.f32 %v1022_v28, %v932_v15 }
0x1210   :  { %1487 = vtanh.f32 %v1024_v29 }
0x121a   :  { %v1488_v30 = vpop.eup %1487 }
0x121b   :  { %1028 = vrot.lane.b32.xlu0 %v1488_v30, %s1500_s4 }
0x128d   :  { %v1029_v32 = vpop.permute.xlu0 %1028 }
0x128e   :  { %v1031_v34 = vmul.f32 %v1029_v32, %v1026_v31 }
0x1290   :  { %v1786_v35 = vadd.f32 %v1032_v33, %v1031_v34 }
0x1292   :  { %v1792_v36 = vsel %vm1039_vm0, %v1786_v35, %v923_v3 }
0x1293   :  { %1058 = vrot.lane.b32.xlu1 %v1792_v36, %s1500_s4 }
0x1305   :  { %v1059_v37 = vpop.permute.xlu1 %1058 }
0x1306   :  { %1381 = vmatmul.mubr.msk.f32.vlgmr.msra.gmra.mrb[8].mxu1 %vm44_vm1, %v1059_v37 }
0x13d9   :  { %v1128_v38 = vpop.f32.mrb[8].mxu1 }
0x13da   :  { %v1129_v39 = vadd.f32 %v1608_v19, %v1128_v38  ;;  %v1382_v41 = vpop.f32.mrb[9].mxu1  ;;  %v1049_v19 = vsel %vm1048_vm5, 1, %v1498_v16 }
0x13dc   :  { %1140 = vrot.lane.b32.xlu0 %v1129_v39, %s1499_s1  ;;  %v1132_v9 = vadd.f32 %v1129_v39, %v1056_v53 }
0x13de   :  { %v1221_v54 = vmul.f32 -1.442695, %v1132_v9 }
0x13e0   :  { %310 = vperm.xlu0 %1446, %v308_v42   ;;  %1489 = vpow2.f32 %v1221_v54 }
0x13e4   :  { %555 = vperm.xlu0 %1446, %v553_v45  }
0x13e8   :  { %803 = vperm.xlu0 %1446, %v801_v46  }
0x13ea   :  { %v1490_v8 = vpop.eup %1489 }
0x13eb   :  { %v1136_v4 = vadd.f32 1.0, %v1490_v8 }
0x13ec   :  { %1051 = vperm.xlu0 %1446, %v1049_v19  }
0x13ed   :  { %1491 = vrcp.f32 %v1136_v4 }
0x13f0   :  { %1174 = vperm.xlu0 %1446, %v1172_v47  }
0x13f4   :  { %422 = vrot.lane.b32.xlu0 %v420_v49, %s1500_s4 }
0x13f7   :  { %v1492_v55 = vpop.eup %1491 }
0x13f8   :  { %670 = vrot.lane.b32.xlu0 %v668_v50, %s1500_s4  ;;  %v1150_v26 = vsub.f32 1.0, %v1492_v55 }
0x13fc   :  { %918 = vrot.lane.b32.xlu0 %v916_v51, %s1500_s4 }
0x144e   :  { %v1141_v0 = vpop.permute.xlu0 %1140 }
0x144f   :  { %v1143_v14 = vmul.f32 %v1492_v55, %v1141_v0 }
0x1451   :  { %1145 = vrot.lane.b32.xlu1 %v1143_v14, %s1499_s1 }
0x1455   :  { %431 = vperm.xlu1 %1445, %v429_v13  }
0x1459   :  { %679 = vperm.xlu1 %1445, %v677_v56  }
0x145d   :  { %927 = vperm.xlu1 %1445, %v925_v57  }
0x145f   :  { %v311_v59 = vpop.permute.xlu0 %310 }
0x1460   :  { %vm312_vm13 = vcmp.eq.s32.totalorder %v311_v59, 1 }
0x1461   :  { %1161 = vperm.xlu1 %1445, %v1159_v58   ;;  %v313_v11 = vsel %vm312_vm13, %v1623_v44, 0.0 }
0x1463   :  { %v556_v60 = vpop.permute.xlu0 %555 }
0x1464   :  { %vm557_vm15 = vcmp.eq.s32.totalorder %v556_v60, 1 }
0x1467   :  { %v804_v61 = vpop.permute.xlu0 %803 }
0x1468   :  { %vm805_vm8 = vcmp.eq.s32.totalorder %v804_v61, 1 }
0x146b   :  { %v1052_v62 = vpop.permute.xlu0 %1051 }
0x146c   :  { %vm1053_vm4 = vcmp.eq.s32.totalorder %v1052_v62, 1 }
0x146f   :  { %v1175_v63 = vpop.permute.xlu0 %1174 }
0x1470   :  { %vm1176_vm12 = vcmp.eq.s32.totalorder %v1175_v63, 1 }
0x1473   :  { %v423_v1 = vpop.permute.xlu0 %422 }
0x1474   :  { %1204 = vst.msk [vmem:[%s1891_s6 + $0x8] sm:$0xff] %vm44_vm1, %v423_v1 }
0x1477   :  { %v671_v3 = vpop.permute.xlu0 %670 }
0x1478   :  { %1210 = vst.msk [vmem:[%s1891_s6 + $0x18] sm:$0xff] %vm44_vm1, %v671_v3 }
0x147b   :  { %v919_v17 = vpop.permute.xlu0 %918 }
0x147c   :  { %1216 = vst.msk [vmem:[%s1891_s6 + $0x28] sm:$0xff] %vm44_vm1, %v919_v17 }
0x14c3   :  { %v1146_v16 = vpop.permute.xlu1 %1145 }
0x14c4   :  { %v1148_v5 = vadd.f32 %v1146_v16, %v1056_v53 }
0x14c6   :  { %1493 = vtanh.f32 %v1148_v5 }
0x14d0   :  { %v1494_v6 = vpop.eup %1493 }
0x14d1   :  { %1152 = vrot.lane.b32.xlu1 %v1494_v6, %s1500_s4 }
0x14d4   :  { %v432_v10 = vpop.permute.xlu1 %431 }
0x14d5   :  { %vm433_vm14 = vcmp.eq.s32.totalorder %v432_v10, 1  ;;  %546 = vrot.lane.b32.xlu1 %v544_v7, %s1500_s4 }
0x14d6   :  { %v434_v15 = vsel %vm433_vm14, %v1672_v12, %v313_v11  ;;  %v1040_v12 = vsel %vm1039_vm0, %v1786_v35, 0.0 }
0x14d7   :  { %v558_v18 = vsel %vm557_vm15, %v1707_v52, %v434_v15 }
0x14d8   :  { %v680_v22 = vpop.permute.xlu1 %679 }
0x14d9   :  { %vm681_vm2 = vcmp.eq.s32.totalorder %v680_v22, 1  ;;  %794 = vrot.lane.b32.xlu1 %v792_v23, %s1500_s4 }
0x14da   :  { %v682_v48 = vsel %vm681_vm2, %v1728_v21, %v558_v18  ;;  %v1156_v21 = vmul.f32 %v1492_v55, %v1792_v36 }
0x14db   :  { %v806_v44 = vsel %vm805_vm8, %v1749_v43, %v682_v48 }
0x14dc   :  { %v928_v24 = vpop.permute.xlu1 %927 }
0x14dd   :  { %vm929_vm3 = vcmp.eq.s32.totalorder %v928_v24, 1  ;;  %1042 = vrot.lane.b32.xlu1 %v1040_v12, %s1500_s4 }
0x14de   :  { %v930_v52 = vsel %vm929_vm3, %v1770_v2, %v806_v44 }
0x14df   :  { %v1054_v40 = vsel %vm1053_vm4, %v1786_v35, %v930_v52 }
0x14e0   :  { %v1162_v25 = vpop.permute.xlu1 %1161 }
0x14e1   :  { %vm1163_vm5 = vcmp.eq.s32.totalorder %v1162_v25, 1 }
0x1543   :  { %v1153_v27 = vpop.permute.xlu1 %1152 }
0x1544   :  { %v1155_v28 = vmul.f32 %v1153_v27, %v1150_v26 }
0x1546   :  { %v1157_v43 = vadd.f32 %v1156_v21, %v1155_v28 }
0x1547   :  { %v547_v29 = vpop.permute.xlu1 %546 }
0x1548   :  { %1207 = vst.msk [vmem:[%s1891_s6 + $0x10] sm:$0xff] %vm44_vm1, %v547_v29  ;;  %v1177_v30 = vsel %vm1176_vm12, %v1157_v43, %v1054_v40  ;;  %v1164_v31 = vsel %vm1163_vm5, %v1157_v43, 0.0 }
0x1549   :  { %1179 = vrot.lane.b32.xlu1 %v1177_v30, %s1500_s4  ;;  %1166 = vrot.lane.b32.xlu0 %v1164_v31, %s1500_s4 }
0x154b   :  { %v795_v2 = vpop.permute.xlu1 %794 }
0x154c   :  { %1213 = vst.msk [vmem:[%s1891_s6 + $0x20] sm:$0xff] %vm44_vm1, %v795_v2 }
0x154f   :  { %v1043_v32 = vpop.permute.xlu1 %1042 }
0x1550   :  { %1219 = vst.msk [vmem:[%s1891_s6 + $0x30] sm:$0xff] %vm44_vm1, %v1043_v32 }
0x15bb   :  { %v1167_v20 = vpop.permute.xlu0 %1166  ;;  %v1180_v33 = vpop.permute.xlu1 %1179 }
0x15bc   :  { %1222 = vst.msk [vmem:[%s1891_s6 + $0x38] sm:$0xff] %vm44_vm1, %v1167_v20  ;;  %1182 = vst.msk [vmem:[%s1892_s7] sm:$0xff] %vm44_vm1, %v1180_v33 }

</bundles_post_ra>
